<compile_context>
chip_gen: v5e
topology: v5e:2x2
jax: 0.10.0
libtpu: 0.0.40
codegen_flags: <defaults>
</compile_context>

<pallas_src>
import functools

import numpy as np
import jax
import jax.numpy as jnp
from jax.experimental import pallas as pl
from jax.experimental.pallas import tpu as pltpu


def _round_up(x: int, m: int) -> int:
    return (x + m - 1) // m * m


def _choose_tiles(n: int, cap_m: int = 1024, cap_k: int = 2048):
    """Pick (Np, tm, tk) for the (row, reduction) smooth grid.

    * Np is padded so BOTH tiles divide it exactly (no ragged fallback to 128).
    * The row grid has >= 2 tiles whenever Np > 128 so v7x megacore sharding
      splits the L stream across both TensorCores.
    * tk is the largest 128-multiple divisor of Np <= cap_k; tm always
      qualifies, so the reduction tile never degrades below tm.
    """
    np0 = _round_up(n, 128)
    if np0 <= 128:
        return np0, np0, np0
    n_row = max(2, -(-np0 // cap_m))
    tm = min(cap_m, _round_up(-(-np0 // n_row), 128))
    np_pad = _round_up(np0, tm)
    tk = tm
    d = (min(cap_k, np_pad) // 128) * 128
    while d > tm:
        if np_pad % d == 0:
            tk = d
            break
        d -= 128
    return np_pad, tm, tk


# ---------------------------------------------------------------------------
# Kernel 1: theta  ->  H = X @ W + b     (bf16 matmul, f32 accumulate/bias)
# ---------------------------------------------------------------------------
def _theta_kernel(x_ref, w_ref, b_ref, o_ref):
    h = jnp.dot(x_ref[...], w_ref[...], preferred_element_type=jnp.float32)
    o_ref[...] = (h + b_ref[...]).astype(o_ref.dtype)   # bf16 store for L @ H


def theta_layer(Xp, Wp_bf16, bp_f32, tm):
    Np, Ci = Xp.shape
    Cop = Wp_bf16.shape[1]
    return pl.pallas_call(
        _theta_kernel,
        out_shape=jax.ShapeDtypeStruct((Np, Cop), jnp.bfloat16),
        grid=(Np // tm,),
        in_specs=[
            pl.BlockSpec((tm, Ci), lambda i: (i, 0)),     # Ci = full dim (may be <128)
            pl.BlockSpec((Ci, Cop), lambda i: (0, 0)),
            pl.BlockSpec((1, Cop), lambda i: (0, 0)),
        ],
        out_specs=pl.BlockSpec((tm, Cop), lambda i: (i, 0)),
        compiler_params=pltpu.CompilerParams(
            dimension_semantics=("parallel",),
            vmem_limit_bytes=32 * 1024 * 1024,
        ),
        cost_estimate=pl.CostEstimate(
            flops=2 * Np * Ci * Cop,
            bytes_accessed=Np * Ci * 2 + Ci * Cop * 2 + Np * Cop * 2,
            transcendentals=0,
        ),
    )(Xp, Wp_bf16, bp_f32)


# ---------------------------------------------------------------------------
# Kernel 2: GCN smoothing  ->  Y = [ReLU]( L @ H )
#   grid = (row tiles, reduction tiles); f32 VMEM accumulator carried across k.
#   H is either VMEM-resident (DMA'd once) or streamed in (tk, Cop) blocks.
# ---------------------------------------------------------------------------
def _smooth_kernel(l_ref, h_ref, o_ref, acc_ref, *, apply_relu: bool, tk: int,
                   resident_h: bool):
    k = pl.program_id(1)

    @pl.when(k == 0)
    def _init():
        acc_ref[...] = jnp.zeros_like(acc_ref)

    if resident_h:
        start = pl.multiple_of(k * tk, tk)
        h = h_ref[pl.ds(start, tk), :]
    else:
        h = h_ref[...]

    acc_ref[...] += jnp.dot(l_ref[...], h, preferred_element_type=jnp.float32)

    @pl.when(k == pl.num_programs(1) - 1)
    def _finalize():
        y = acc_ref[...]
        if apply_relu:
            y = jnp.maximum(y, 0.0)
        o_ref[...] = y.astype(o_ref.dtype)


def smooth_layer(Lp_bf16, H_bf16, *, apply_relu, out_dtype, tm, tk,
                 resident_h_bytes=8 * 1024 * 1024):
    Np = Lp_bf16.shape[0]
    Cop = H_bf16.shape[1]
    grid = (Np // tm, Np // tk)

    h_bytes = Np * Cop * H_bf16.dtype.itemsize
    resident_h = h_bytes <= resident_h_bytes
    if resident_h:
        # Constant block index -> Pallas DMAs H exactly once (no per-row restream).
        h_spec = pl.BlockSpec((Np, Cop), lambda i, k: (0, 0))
        h_traffic = h_bytes
    else:
        h_spec = pl.BlockSpec((tk, Cop), lambda i, k: (k, 0))
        h_traffic = grid[0] * h_bytes

    out_itemsize = jnp.dtype(out_dtype).itemsize
    return pl.pallas_call(
        functools.partial(_smooth_kernel, apply_relu=apply_relu, tk=tk,
                          resident_h=resident_h),
        out_shape=jax.ShapeDtypeStruct((Np, Cop), out_dtype),
        grid=grid,
        in_specs=[
            pl.BlockSpec((tm, tk), lambda i, k: (i, k)),   # L streams over (i, k)
            h_spec,
        ],
        out_specs=pl.BlockSpec((tm, Cop), lambda i, k: (i, 0)),
        scratch_shapes=[pltpu.VMEM((tm, Cop), jnp.float32)],
        compiler_params=pltpu.CompilerParams(
            dimension_semantics=("parallel", "arbitrary"),
            vmem_limit_bytes=40 * 1024 * 1024,   # safe under v7x's 64 MiB physical VMEM
        ),
        cost_estimate=pl.CostEstimate(
            flops=2 * Np * Np * Cop,
            bytes_accessed=Np * Np * 2 + h_traffic + Np * Cop * out_itemsize,
            transcendentals=0,
        ),
    )(Lp_bf16, H_bf16)


# ---------------------------------------------------------------------------
# Glue: Graph.from_hypergraph_hypergcn + GCN-normalized Laplacian (plain JAX)
# ---------------------------------------------------------------------------
def build_hypergcn_graph(X, hyperedges, rv):
    """hyperedges: int32 (E, K) vertex indices per hyperedge (fixed size K)."""
    N = X.shape[0]
    E, K = hyperedges.shape
    p = (X @ rv)[:, 0]                       # (N,) random projection
    pe = p[hyperedges]                       # (E, K)
    ia = jnp.argmax(pe, axis=1)
    ib = jnp.argmin(pe, axis=1)
    rows = jnp.arange(E)
    u = hyperedges[rows, ia]
    v = hyperedges[rows, ib]
    w = jnp.where(u != v, 1.0 / K, 0.0)      # weight 1/|e|; drop self-loops

    A = jnp.zeros((N, N), jnp.float32)
    A = A.at[u, v].add(w)
    A = A.at[v, u].add(w)                    # undirected, duplicates summed
    A_hat = A + jnp.eye(N, dtype=jnp.float32)
    d_inv_sqrt = 1.0 / jnp.sqrt(jnp.sum(A_hat, axis=1))
    return d_inv_sqrt[:, None] * A_hat * d_inv_sqrt[None, :]


# ---------------------------------------------------------------------------
# Full HyperGCN forward (fast=True: graph cached from raw input X)
# ---------------------------------------------------------------------------
def hypergcn_forward(X, hyperedges, rv, W1, b1, W2, b2, *,
                     cap_m=1024, cap_k=2048,
                     resident_h_bytes=8 * 1024 * 1024):
    N, Cin = X.shape
    Hid = W1.shape[1]
    Ncls = W2.shape[1]

    L = build_hypergcn_graph(X, hyperedges, rv)          # cached_g

    Np, tm, tk = _choose_tiles(N, cap_m, cap_k)
    Cop1 = _round_up(Hid, 128)
    Cop2 = _round_up(Ncls, 128)

    # Pad ONCE; cast the dominant N^2 stream (L) and X to bf16 once.
    Lp = jnp.pad(L, ((0, Np - N), (0, Np - N))).astype(jnp.bfloat16)
    Xp = jnp.pad(X, ((0, Np - N), (0, 0))).astype(jnp.bfloat16)   # feature dim unpadded
    W1p = jnp.pad(W1, ((0, 0), (0, Cop1 - Hid))).astype(jnp.bfloat16)
    b1p = jnp.pad(b1, (0, Cop1 - Hid))[None, :]
    W2p = jnp.pad(W2, ((0, Cop1 - Hid), (0, Cop2 - Ncls))).astype(jnp.bfloat16)
    b2p = jnp.pad(b2, (0, Cop2 - Ncls))[None, :]

    # layer 1: theta -> GCN smoothing -> ReLU   (eval-mode dropout = identity)
    H1 = theta_layer(Xp, W1p, b1p, tm)
    Y1 = smooth_layer(Lp, H1, apply_relu=True, out_dtype=jnp.bfloat16,
                      tm=tm, tk=tk, resident_h_bytes=resident_h_bytes)
    # layer 2 (is_last): theta -> GCN smoothing
    H2 = theta_layer(Y1, W2p, b2p, tm)
    Y2 = smooth_layer(Lp, H2, apply_relu=False, out_dtype=jnp.float32,
                      tm=tm, tk=tk, resident_h_bytes=resident_h_bytes)

    return Y2[:N, :Ncls]


# ---------------------------------------------------------------------------
# Pure-JAX reference with the SAME precision policy (bf16 matmuls, f32 accum)
# ---------------------------------------------------------------------------
def _reference_forward(X, hyperedges, rv, W1, b1, W2, b2):
    L16 = build_hypergcn_graph(X, hyperedges, rv).astype(jnp.bfloat16)

    def theta(x, w, bvec):
        h = jnp.dot(x.astype(jnp.bfloat16), w.astype(jnp.bfloat16),
                    preferred_element_type=jnp.float32)
        return (h + bvec[None, :]).astype(jnp.bfloat16)

    h1 = theta(X, W1, b1)
    y1 = jnp.maximum(jnp.dot(L16, h1, preferred_element_type=jnp.float32), 0.0)
    h2 = theta(y1, W2, b2)
    return jnp.dot(L16, h2, preferred_element_type=jnp.float32)


if __name__ == "__main__":
    # Small, deterministic problem. N=300 -> Np is chosen by _choose_tiles.
    N, IN_C, HID_C, NUM_CLASSES = 300, 16, 32, 4
    E, K = 64, 4

    key = jax.random.PRNGKey(0)
    kx, krv, kw1, kb1, kw2, kb2 = jax.random.split(key, 6)

    X = jax.random.normal(kx, (N, IN_C), dtype=jnp.float32)
    rv = jax.random.uniform(krv, (IN_C, 1), dtype=jnp.float32)

    # Deterministic synthetic hypergraph: E hyperedges of K distinct vertices
    hyperedges = np.array(
        [[(3 * e + 7 * j) % N for j in range(K)] for e in range(E)],
        dtype=np.int32,
    )
    hyperedges = jnp.asarray(hyperedges)

    # Linear params (stored as (in, out); torch Linear weight is (out, in))
    W1 = jax.random.normal(kw1, (IN_C, HID_C), dtype=jnp.float32) / np.sqrt(IN_C)
    b1 = jax.random.normal(kb1, (HID_C,), dtype=jnp.float32) * 0.1
    W2 = jax.random.normal(kw2, (HID_C, NUM_CLASSES), dtype=jnp.float32) / np.sqrt(HID_C)
    b2 = jax.random.normal(kb2, (NUM_CLASSES,), dtype=jnp.float32) * 0.1

    ref = np.asarray(_reference_forward(X, hyperedges, rv, W1, b1, W2, b2))

    # 1) default tile caps (large tiles, resident H, single reduction step)
    # 2) small caps (128/128) -> multi-step reduction with resident-H dyn-slice path
    # 3) small caps + resident_h_bytes=0 -> streaming-H path
    configs = [
        dict(cap_m=1024, cap_k=2048, resident_h_bytes=8 * 1024 * 1024),
        dict(cap_m=128, cap_k=128, resident_h_bytes=8 * 1024 * 1024),
        dict(cap_m=128, cap_k=128, resident_h_bytes=0),
    ]
    for cfg in configs:
        fwd = jax.jit(functools.partial(hypergcn_forward, **cfg))
        out = jax.block_until_ready(fwd(X, hyperedges, rv, W1, b1, W2, b2))
        assert out.shape == (N, NUM_CLASSES)
        np.testing.assert_allclose(np.asarray(out), ref, rtol=2e-3, atol=2e-3)

    print("KERNEL_OK")
</pallas_src>

<mosaic_0001>
module attributes {stable_mosaic.version = 11 : i64} {
  func.func @_smooth_kernel(%arg0: i32, %arg1: i32, %arg2: memref<256x512xbf16, #tpu.memory_space<vmem>>, %arg3: memref<512x128xbf16, #tpu.memory_space<vmem>>, %arg4: memref<256x128xbf16, #tpu.memory_space<vmem>>, %arg5: memref<256x128xf32, #tpu.memory_space<vmem>>) attributes {dimension_semantics = [#tpu.dimension_semantics<parallel>, #tpu.dimension_semantics<arbitrary>], iteration_bounds = array<i64: 2, 1>, scalar_prefetch = 0 : i64, scratch_operands = 1 : i64, tpu.core_type = #tpu.core_type<tc>, window_params = [{transform_indices = @transform_0, window_bounds = array<i64: 256, 512>}, {pipeline_mode = #tpu.pipeline_mode<synchronous>, transform_indices = @transform_1, window_bounds = array<i64: 512, 128>}, {transform_indices = @transform_2, window_bounds = array<i64: 256, 128>}]} {
    %c0_i32 = arith.constant 0 : i32
    %0 = arith.cmpi eq, %arg1, %c0_i32 : i32
    %1 = arith.extui %0 : i1 to i32
    %c0_i32_0 = arith.constant 0 : i32
    %2 = arith.cmpi ne, %1, %c0_i32_0 : i32
    scf.if %2 {
      %cst_9 = arith.constant 0.000000e+00 : f32
      %15 = vector.broadcast %cst_9 : f32 to vector<256x128xf32>
      %c0_10 = arith.constant 0 : index
      %c0_11 = arith.constant 0 : index
      %16 = vector.load %arg5[%c0_10, %c0_11] : memref<256x128xf32, #tpu.memory_space<vmem>>, vector<256x128xf32>
      tpu.vector_store %arg5[%c0_10, %c0_11], %15 {strides = array<i32>} : memref<256x128xf32, #tpu.memory_space<vmem>>, vector<256x128xf32>,
    } else {
    }
    %c512_i32 = arith.constant 512 : i32
    %3 = arith.muli %arg1, %c512_i32 : i32
    %4 = tpu.assume_multiple %3, 512 : i32
    %5 = arith.index_cast %4 : i32 to index
    %c0 = arith.constant 0 : index
    %6 = vector.load %arg3[%5, %c0] : memref<512x128xbf16, #tpu.memory_space<vmem>>, vector<512x128xbf16>
    %c0_1 = arith.constant 0 : index
    %c0_2 = arith.constant 0 : index
    %7 = vector.load %arg5[%c0_1, %c0_2] : memref<256x128xf32, #tpu.memory_space<vmem>>, vector<256x128xf32>
    %c0_3 = arith.constant 0 : index
    %c0_4 = arith.constant 0 : index
    %8 = vector.load %arg2[%c0_3, %c0_4] : memref<256x512xbf16, #tpu.memory_space<vmem>>, vector<256x512xbf16>
    %cst = arith.constant dense<0.000000e+00> : vector<256x128xf32>
    %9 = tpu.matmul %8, %6, %cst {dimension_numbers = #tpu.dot_dimension_numbers<[1], [0], [0], [1], [0, 0, 1, 1], [], []>} : vector<256x512xbf16>, vector<512x128xbf16>, vector<256x128xf32> -> vector<256x128xf32>
    %10 = arith.addf %7, %9 : vector<256x128xf32>
    %c0_5 = arith.constant 0 : index
    %c0_6 = arith.constant 0 : index
    %11 = vector.load %arg5[%c0_5, %c0_6] : memref<256x128xf32, #tpu.memory_space<vmem>>, vector<256x128xf32>
    tpu.vector_store %arg5[%c0_5, %c0_6], %10 {strides = array<i32>} : memref<256x128xf32, #tpu.memory_space<vmem>>, vector<256x128xf32>,
    %c0_i32_7 = arith.constant 0 : i32
    %12 = arith.cmpi eq, %arg1, %c0_i32_7 : i32
    %13 = arith.extui %12 : i1 to i32
    %c0_i32_8 = arith.constant 0 : i32
    %14 = arith.cmpi ne, %13, %c0_i32_8 : i32
    scf.if %14 {
      %c0_9 = arith.constant 0 : index
      %c0_10 = arith.constant 0 : index
      %15 = vector.load %arg5[%c0_9, %c0_10] : memref<256x128xf32, #tpu.memory_space<vmem>>, vector<256x128xf32>
      %cst_11 = arith.constant 0.000000e+00 : f32
      %16 = vector.broadcast %cst_11 : f32 to vector<256x128xf32>
      %17 = arith.maximumf %15, %16 : vector<256x128xf32>
      %18 = arith.truncf %17 : vector<256x128xf32> to vector<256x128xbf16>
      %c0_12 = arith.constant 0 : index
      %c0_13 = arith.constant 0 : index
      %19 = vector.load %arg4[%c0_12, %c0_13] : memref<256x128xbf16, #tpu.memory_space<vmem>>, vector<256x128xbf16>
      tpu.vector_store %arg4[%c0_12, %c0_13], %18 {strides = array<i32>} : memref<256x128xbf16, #tpu.memory_space<vmem>>, vector<256x128xbf16>,
    } else {
    }
    return
  }
  func.func @transform_0(%arg0: i32, %arg1: i32) -> (i32, i32) {
    %c0_i32 = arith.constant 0 : i32
    return %arg0, %arg1 : i32, i32
  }
  func.func @transform_1(%arg0: i32, %arg1: i32) -> (i32, i32) {
    %c0_i32 = arith.constant 0 : i32
    %c0_i32_0 = arith.constant 0 : i32
    %c0_i32_1 = arith.constant 0 : i32
    return %c0_i32, %c0_i32_0 : i32, i32
  }
  func.func @transform_2(%arg0: i32, %arg1: i32) -> (i32, i32) {
    %c0_i32 = arith.constant 0 : i32
    %c0_i32_0 = arith.constant 0 : i32
    return %arg0, %c0_i32 : i32, i32
  }
}

module attributes {stable_mosaic.version = 11 : i64} {
  func.func @_theta_kernel(%arg0: i32, %arg1: memref<256x16xbf16, #tpu.memory_space<vmem>>, %arg2: memref<16x128xbf16, #tpu.memory_space<vmem>>, %arg3: memref<1x128xf32, #tpu.memory_space<vmem>>, %arg4: memref<256x128xbf16, #tpu.memory_space<vmem>>) attributes {dimension_semantics = [#tpu.dimension_semantics<parallel>], iteration_bounds = array<i64: 2>, scalar_prefetch = 0 : i64, scratch_operands = 0 : i64, tpu.core_type = #tpu.core_type<tc>, window_params = [{transform_indices = @transform_0, window_bounds = array<i64: 256, 16>}, {pipeline_mode = #tpu.pipeline_mode<synchronous>, transform_indices = @transform_1, window_bounds = array<i64: 16, 128>}, {pipeline_mode = #tpu.pipeline_mode<synchronous>, transform_indices = @transform_2, window_bounds = array<i64: 1, 128>}, {transform_indices = @transform_3, window_bounds = array<i64: 256, 128>}]} {
    %c0 = arith.constant 0 : index
    %c0_0 = arith.constant 0 : index
    %0 = vector.load %arg1[%c0, %c0_0] : memref<256x16xbf16, #tpu.memory_space<vmem>>, vector<256x16xbf16>
    %c0_1 = arith.constant 0 : index
    %c0_2 = arith.constant 0 : index
    %1 = vector.load %arg2[%c0_1, %c0_2] : memref<16x128xbf16, #tpu.memory_space<vmem>>, vector<16x128xbf16>
    %cst = arith.constant dense<0.000000e+00> : vector<256x128xf32>
    %2 = tpu.matmul %0, %1, %cst {dimension_numbers = #tpu.dot_dimension_numbers<[1], [0], [0], [1], [0, 0, 1, 1], [], []>} : vector<256x16xbf16>, vector<16x128xbf16>, vector<256x128xf32> -> vector<256x128xf32>
    %c0_3 = arith.constant 0 : index
    %c0_4 = arith.constant 0 : index
    %3 = vector.load %arg3[%c0_3, %c0_4] : memref<1x128xf32, #tpu.memory_space<vmem>>, vector<1x128xf32>
    %4 = vector.broadcast %3 : vector<1x128xf32> to vector<256x128xf32>
    %5 = arith.addf %2, %4 : vector<256x128xf32>
    %6 = arith.truncf %5 : vector<256x128xf32> to vector<256x128xbf16>
    %c0_5 = arith.constant 0 : index
    %c0_6 = arith.constant 0 : index
    %7 = vector.load %arg4[%c0_5, %c0_6] : memref<256x128xbf16, #tpu.memory_space<vmem>>, vector<256x128xbf16>
    tpu.vector_store %arg4[%c0_5, %c0_6], %6 {strides = array<i32>} : memref<256x128xbf16, #tpu.memory_space<vmem>>, vector<256x128xbf16>,
    return
  }
  func.func @transform_0(%arg0: i32) -> (i32, i32) {
    %c0_i32 = arith.constant 0 : i32
    %c0_i32_0 = arith.constant 0 : i32
    return %arg0, %c0_i32 : i32, i32
  }
  func.func @transform_1(%arg0: i32) -> (i32, i32) {
    %c0_i32 = arith.constant 0 : i32
    %c0_i32_0 = arith.constant 0 : i32
    %c0_i32_1 = arith.constant 0 : i32
    return %c0_i32, %c0_i32_0 : i32, i32
  }
  func.func @transform_2(%arg0: i32) -> (i32, i32) {
    %c0_i32 = arith.constant 0 : i32
    %c0_i32_0 = arith.constant 0 : i32
    %c0_i32_1 = arith.constant 0 : i32
    return %c0_i32, %c0_i32_0 : i32, i32
  }
  func.func @transform_3(%arg0: i32) -> (i32, i32) {
    %c0_i32 = arith.constant 0 : i32
    %c0_i32_0 = arith.constant 0 : i32
    return %arg0, %c0_i32 : i32, i32
  }
}

module attributes {stable_mosaic.version = 11 : i64} {
  func.func @_smooth_kernel(%arg0: i32, %arg1: i32, %arg2: memref<256x512xbf16, #tpu.memory_space<vmem>>, %arg3: memref<512x128xbf16, #tpu.memory_space<vmem>>, %arg4: memref<256x128xf32, #tpu.memory_space<vmem>>, %arg5: memref<256x128xf32, #tpu.memory_space<vmem>>) attributes {dimension_semantics = [#tpu.dimension_semantics<parallel>, #tpu.dimension_semantics<arbitrary>], iteration_bounds = array<i64: 2, 1>, scalar_prefetch = 0 : i64, scratch_operands = 1 : i64, tpu.core_type = #tpu.core_type<tc>, window_params = [{transform_indices = @transform_0, window_bounds = array<i64: 256, 512>}, {pipeline_mode = #tpu.pipeline_mode<synchronous>, transform_indices = @transform_1, window_bounds = array<i64: 512, 128>}, {transform_indices = @transform_2, window_bounds = array<i64: 256, 128>}]} {
    %c0_i32 = arith.constant 0 : i32
    %0 = arith.cmpi eq, %arg1, %c0_i32 : i32
    %1 = arith.extui %0 : i1 to i32
    %c0_i32_0 = arith.constant 0 : i32
    %2 = arith.cmpi ne, %1, %c0_i32_0 : i32
    scf.if %2 {
      %cst_9 = arith.constant 0.000000e+00 : f32
      %15 = vector.broadcast %cst_9 : f32 to vector<256x128xf32>
      %c0_10 = arith.constant 0 : index
      %c0_11 = arith.constant 0 : index
      %16 = vector.load %arg5[%c0_10, %c0_11] : memref<256x128xf32, #tpu.memory_space<vmem>>, vector<256x128xf32>
      tpu.vector_store %arg5[%c0_10, %c0_11], %15 {strides = array<i32>} : memref<256x128xf32, #tpu.memory_space<vmem>>, vector<256x128xf32>,
    } else {
    }
    %c512_i32 = arith.constant 512 : i32
    %3 = arith.muli %arg1, %c512_i32 : i32
    %4 = tpu.assume_multiple %3, 512 : i32
    %5 = arith.index_cast %4 : i32 to index
    %c0 = arith.constant 0 : index
    %6 = vector.load %arg3[%5, %c0] : memref<512x128xbf16, #tpu.memory_space<vmem>>, vector<512x128xbf16>
    %c0_1 = arith.constant 0 : index
    %c0_2 = arith.constant 0 : index
    %7 = vector.load %arg5[%c0_1, %c0_2] : memref<256x128xf32, #tpu.memory_space<vmem>>, vector<256x128xf32>
    %c0_3 = arith.constant 0 : index
    %c0_4 = arith.constant 0 : index
    %8 = vector.load %arg2[%c0_3, %c0_4] : memref<256x512xbf16, #tpu.memory_space<vmem>>, vector<256x512xbf16>
    %cst = arith.constant dense<0.000000e+00> : vector<256x128xf32>
    %9 = tpu.matmul %8, %6, %cst {dimension_numbers = #tpu.dot_dimension_numbers<[1], [0], [0], [1], [0, 0, 1, 1], [], []>} : vector<256x512xbf16>, vector<512x128xbf16>, vector<256x128xf32> -> vector<256x128xf32>
    %10 = arith.addf %7, %9 : vector<256x128xf32>
    %c0_5 = arith.constant 0 : index
    %c0_6 = arith.constant 0 : index
    %11 = vector.load %arg5[%c0_5, %c0_6] : memref<256x128xf32, #tpu.memory_space<vmem>>, vector<256x128xf32>
    tpu.vector_store %arg5[%c0_5, %c0_6], %10 {strides = array<i32>} : memref<256x128xf32, #tpu.memory_space<vmem>>, vector<256x128xf32>,
    %c0_i32_7 = arith.constant 0 : i32
    %12 = arith.cmpi eq, %arg1, %c0_i32_7 : i32
    %13 = arith.extui %12 : i1 to i32
    %c0_i32_8 = arith.constant 0 : i32
    %14 = arith.cmpi ne, %13, %c0_i32_8 : i32
    scf.if %14 {
      %c0_9 = arith.constant 0 : index
      %c0_10 = arith.constant 0 : index
      %15 = vector.load %arg5[%c0_9, %c0_10] : memref<256x128xf32, #tpu.memory_space<vmem>>, vector<256x128xf32>
      %c0_11 = arith.constant 0 : index
      %c0_12 = arith.constant 0 : index
      %16 = vector.load %arg4[%c0_11, %c0_12] : memref<256x128xf32, #tpu.memory_space<vmem>>, vector<256x128xf32>
      tpu.vector_store %arg4[%c0_11, %c0_12], %15 {strides = array<i32>} : memref<256x128xf32, #tpu.memory_space<vmem>>, vector<256x128xf32>,
    } else {
    }
    return
  }
  func.func @transform_0(%arg0: i32, %arg1: i32) -> (i32, i32) {
    %c0_i32 = arith.constant 0 : i32
    return %arg0, %arg1 : i32, i32
  }
  func.func @transform_1(%arg0: i32, %arg1: i32) -> (i32, i32) {
    %c0_i32 = arith.constant 0 : i32
    %c0_i32_0 = arith.constant 0 : i32
    %c0_i32_1 = arith.constant 0 : i32
    return %c0_i32, %c0_i32_0 : i32, i32
  }
  func.func @transform_2(%arg0: i32, %arg1: i32) -> (i32, i32) {
    %c0_i32 = arith.constant 0 : i32
    %c0_i32_0 = arith.constant 0 : i32
    return %arg0, %c0_i32 : i32, i32
  }
}

module attributes {stable_mosaic.version = 11 : i64} {
  func.func @_theta_kernel(%arg0: i32, %arg1: memref<256x128xbf16, #tpu.memory_space<vmem>>, %arg2: memref<128x128xbf16, #tpu.memory_space<vmem>>, %arg3: memref<1x128xf32, #tpu.memory_space<vmem>>, %arg4: memref<256x128xbf16, #tpu.memory_space<vmem>>) attributes {dimension_semantics = [#tpu.dimension_semantics<parallel>], iteration_bounds = array<i64: 2>, scalar_prefetch = 0 : i64, scratch_operands = 0 : i64, tpu.core_type = #tpu.core_type<tc>, window_params = [{transform_indices = @transform_0, window_bounds = array<i64: 256, 128>}, {pipeline_mode = #tpu.pipeline_mode<synchronous>, transform_indices = @transform_1, window_bounds = array<i64: 128, 128>}, {pipeline_mode = #tpu.pipeline_mode<synchronous>, transform_indices = @transform_2, window_bounds = array<i64: 1, 128>}, {transform_indices = @transform_3, window_bounds = array<i64: 256, 128>}]} {
    %c0 = arith.constant 0 : index
    %c0_0 = arith.constant 0 : index
    %0 = vector.load %arg1[%c0, %c0_0] : memref<256x128xbf16, #tpu.memory_space<vmem>>, vector<256x128xbf16>
    %c0_1 = arith.constant 0 : index
    %c0_2 = arith.constant 0 : index
    %1 = vector.load %arg2[%c0_1, %c0_2] : memref<128x128xbf16, #tpu.memory_space<vmem>>, vector<128x128xbf16>
    %cst = arith.constant dense<0.000000e+00> : vector<256x128xf32>
    %2 = tpu.matmul %0, %1, %cst {dimension_numbers = #tpu.dot_dimension_numbers<[1], [0], [0], [1], [0, 0, 1, 1], [], []>} : vector<256x128xbf16>, vector<128x128xbf16>, vector<256x128xf32> -> vector<256x128xf32>
    %c0_3 = arith.constant 0 : index
    %c0_4 = arith.constant 0 : index
    %3 = vector.load %arg3[%c0_3, %c0_4] : memref<1x128xf32, #tpu.memory_space<vmem>>, vector<1x128xf32>
    %4 = vector.broadcast %3 : vector<1x128xf32> to vector<256x128xf32>
    %5 = arith.addf %2, %4 : vector<256x128xf32>
    %6 = arith.truncf %5 : vector<256x128xf32> to vector<256x128xbf16>
    %c0_5 = arith.constant 0 : index
    %c0_6 = arith.constant 0 : index
    %7 = vector.load %arg4[%c0_5, %c0_6] : memref<256x128xbf16, #tpu.memory_space<vmem>>, vector<256x128xbf16>
    tpu.vector_store %arg4[%c0_5, %c0_6], %6 {strides = array<i32>} : memref<256x128xbf16, #tpu.memory_space<vmem>>, vector<256x128xbf16>,
    return
  }
  func.func @transform_0(%arg0: i32) -> (i32, i32) {
    %c0_i32 = arith.constant 0 : i32
    %c0_i32_0 = arith.constant 0 : i32
    return %arg0, %c0_i32 : i32, i32
  }
  func.func @transform_1(%arg0: i32) -> (i32, i32) {
    %c0_i32 = arith.constant 0 : i32
    %c0_i32_0 = arith.constant 0 : i32
    %c0_i32_1 = arith.constant 0 : i32
    return %c0_i32, %c0_i32_0 : i32, i32
  }
  func.func @transform_2(%arg0: i32) -> (i32, i32) {
    %c0_i32 = arith.constant 0 : i32
    %c0_i32_0 = arith.constant 0 : i32
    %c0_i32_1 = arith.constant 0 : i32
    return %c0_i32, %c0_i32_0 : i32, i32
  }
  func.func @transform_3(%arg0: i32) -> (i32, i32) {
    %c0_i32 = arith.constant 0 : i32
    %c0_i32_0 = arith.constant 0 : i32
    return %arg0, %c0_i32 : i32, i32
  }
}

</mosaic_0001>

<bundles_post_ra>
// kernel: hypergcn_forward.4
= control target key start
LH: loop header
LB: loop body
LE: loop exit
PB: predicated region body
PF: predicated region fallthrough
CT: control target
= control target key end

     0   :  { %s804_s12 = smov 0   ;;  %s902_s0 = inlined_call_operand.vmem [shape: bf16[512,16], index: 0, kind: input, shape index: {}]   ;;  %s903_s1 = inlined_call_operand.vmem [shape: bf16[16,128], index: 1, kind: input, shape index: {}]   ;;  %s904_s2 = inlined_call_operand.vmem [shape: f32[1,128], index: 2, kind: input, shape index: {}]   ;;  %s905_s3 = inlined_call_operand.vmem [shape: bf16[512,128], index: 3, kind: output, shape index: {}]  }
   0x1 LB: > { %s557_s13 = sadd.s32 4294967295, %s782_s12   ;;  %p561_p0 = scmp.ge.s32.totalorder %s782_s12, 1  ;;  %s782_s12 = sphi %s804_s12, %s13_s12  }
   0x2   : > { %p138_p1 = scmp.lt.s32.totalorder %s782_s12, 3 }
   0x4   : > { %p139_p2 = pnand %p561_p0, %p138_p1 }
   0x5   : > { %s562_s16 = sshll.u32 (!%p139_p2), %s557_s13, 5 }
   0x6   : > { %142 = sbr.rel (%p139_p2) target bundleno = 211 (0xd3), region = 32  ;;  %p163_p3 = scmp.lt.s32.totalorder (!%p139_p2), %s562_s16, 63 }
   0xb   : > { %v668_v0 = vld [vmem:[%s903_s1] sm:$0xff]  ;;  %s907_s16 = smov (!%p163_p3, %s562_s16), 63  ;;  %vm299_vm0 = vcmask 130048  }
   0xc   : > { %355 = vmatpush.bf16.msra.mxu0 %v668_v0  ;;  %764 = vmatpush.bf16.msra.mxu1 %v668_v0  ;;  %s563_s17 = sshll.u32 %s907_s16, 2  ;;  %v842_v19 = vld [vmem:[%s904_s2] ss:$0 sm:$0xff] }
   0xd   : > { %765 = vmatpush.bf16.msra.mxu2 %v668_v0  ;;  %766 = vmatpush.bf16.msra.mxu3 %v668_v0  ;;  %s166_s20 = scalar_lea.vmem %s902_s0, %s563_s17  ;;  %s853_s25 = scalar_lea.vmem %s905_s3, %s563_s17 }
   0xe   : > { %v652_v1 = vld [vmem:[%s166_s20] sm:$0xff]  ;;  %v653_v5 = vld [vmem:[%s166_s20 + $0x8] sm:$0xff]  ;;  %v654_v9 = vld [vmem:[%s166_s20 + $0x10] sm:$0xff] }
   0xf   : > { %v656_v2 = vld [vmem:[%s166_s20 + $0x20] sm:$0xff]  ;;  %634 = vmatmul.msk.bf16.vlgmr.msra.gmra.mxu0 %vm299_vm0, %v652_v1  ;;  %v657_v6 = vld [vmem:[%s166_s20 + $0x28] sm:$0xff]  ;;  %v658_v10 = vld [vmem:[%s166_s20 + $0x30] sm:$0xff] }
  0x10   : > { %v660_v3 = vld [vmem:[%s166_s20 + $0x40] sm:$0xff]  ;;  %638 = vmatmul.msk.bf16.vlgmr.msra.gmra.mxu1 %vm299_vm0, %v656_v2  ;;  %v661_v7 = vld [vmem:[%s166_s20 + $0x48] sm:$0xff]  ;;  %v662_v11 = vld [vmem:[%s166_s20 + $0x50] sm:$0xff] }
  0x11   : > { %v664_v4 = vld [vmem:[%s166_s20 + $0x60] sm:$0xff]  ;;  %642 = vmatmul.msk.bf16.vlgmr.msra.gmra.mxu2 %vm299_vm0, %v660_v3  ;;  %v665_v8 = vld [vmem:[%s166_s20 + $0x68] sm:$0xff]  ;;  %v666_v12 = vld [vmem:[%s166_s20 + $0x70] sm:$0xff] }
  0x12   : > { %646 = vmatmul.msk.bf16.vlgmr.msra.gmra.mxu3 %vm299_vm0, %v664_v4  ;;  %v655_v13 = vld [vmem:[%s166_s20 + $0x18] sm:$0xff] }
  0x13   : > { %v659_v14 = vld [vmem:[%s166_s20 + $0x38] sm:$0xff] }
  0x14   : > { %v663_v15 = vld [vmem:[%s166_s20 + $0x58] sm:$0xff] }
  0x15   : > { %v667_v16 = vld [vmem:[%s166_s20 + $0x78] sm:$0xff] }
  0x1f   : > { %635 = vmatmul.msk.bf16.gmra.mxu0 %vm299_vm0, %v653_v5 }
  0x20   : > { %639 = vmatmul.msk.bf16.gmra.mxu1 %vm299_vm0, %v657_v6 }
  0x21   : > { %643 = vmatmul.msk.bf16.gmra.mxu2 %vm299_vm0, %v661_v7 }
  0x22   : > { %647 = vmatmul.msk.bf16.gmra.mxu3 %vm299_vm0, %v665_v8 }
  0x2f   : > { %636 = vmatmul.msk.bf16.gmra.mxu0 %vm299_vm0, %v654_v9 }
  0x30   : > { %640 = vmatmul.msk.bf16.gmra.mxu1 %vm299_vm0, %v658_v10 }
  0x31   : > { %644 = vmatmul.msk.bf16.gmra.mxu2 %vm299_vm0, %v662_v11 }
  0x32   : > { %648 = vmatmul.msk.bf16.gmra.mxu3 %vm299_vm0, %v666_v12 }
  0x3f   : > { %637 = vmatmul.msk.bf16.gmra.mxu0 %vm299_vm0, %v655_v13 }
  0x40   : > { %641 = vmatmul.msk.bf16.gmra.mxu1 %vm299_vm0, %v659_v14 }
  0x41   : > { %645 = vmatmul.msk.bf16.gmra.mxu2 %vm299_vm0, %v663_v15 }
  0x42   : > { %649 = vmatmul.msk.bf16.gmra.mxu3 %vm299_vm0, %v667_v16 }
  0x8c   : > { %v357_v17 = vpop.f32.mrf.mxu0 }
  0x8d   : > { %v377_v18 = vpop.f32.mrf.mxu1  ;;  %v358_v24 = vadd.f32 %v842_v19, %v357_v17 }
  0x8e   : > { %v378_v25 = vadd.f32 %v842_v19, %v377_v18 }
  0x94   : > { %v397_v20 = vpop.f32.mrf.mxu2  ;;  %v359_v22 = vpop.f32.mrf.mxu0 }
  0x95   : > { %v417_v21 = vpop.f32.mrf.mxu3  ;;  %v379_v23 = vpop.f32.mrf.mxu1  ;;  %v360_v26 = vadd.f32 %v842_v19, %v359_v22  ;;  %v398_v32 = vadd.f32 %v842_v19, %v397_v20 }
  0x96   : > { %v380_v27 = vadd.f32 %v842_v19, %v379_v23  ;;  %v418_v33 = vadd.f32 %v842_v19, %v417_v21 }
  0x97   : > { %v672_v28 = vpack.c.bf16 %v360_v26, %v358_v24 }
  0x98   : > { %v692_v29 = vpack.c.bf16 %v380_v27, %v378_v25 }
  0x99   : > { %673 = vst [vmem:[%s853_s25] sm:$0xff] %v672_v28  }
  0x9a   : > { %752 = vst [vmem:[%s853_s25 + $0x20] sm:$0xff] %v692_v29  }
  0x9c   : > { %v399_v30 = vpop.f32.mrf.mxu2  ;;  %v362_v36 = vpop.f32.mrf.mxu0 }
  0x9d   : > { %v419_v31 = vpop.f32.mrf.mxu3  ;;  %v400_v34 = vadd.f32 %v842_v19, %v399_v30  ;;  %v382_v37 = vpop.f32.mrf.mxu1  ;;  %v363_v44 = vadd.f32 %v842_v19, %v362_v36 }
  0x9e   : > { %v420_v35 = vadd.f32 %v842_v19, %v419_v31  ;;  %v383_v45 = vadd.f32 %v842_v19, %v382_v37 }
  0x9f   : > { %v712_v38 = vpack.c.bf16 %v400_v34, %v398_v32 }
  0xa0   : > { %v732_v39 = vpack.c.bf16 %v420_v35, %v418_v33 }
  0xa1   : > { %756 = vst [vmem:[%s853_s25 + $0x40] sm:$0xff] %v712_v38  }
  0xa2   : > { %760 = vst [vmem:[%s853_s25 + $0x60] sm:$0xff] %v732_v39  }
  0xa4   : > { %v402_v40 = vpop.f32.mrf.mxu2  ;;  %v364_v42 = vpop.f32.mrf.mxu0 }
  0xa5   : > { %v422_v41 = vpop.f32.mrf.mxu3  ;;  %v384_v43 = vpop.f32.mrf.mxu1  ;;  %v365_v46 = vadd.f32 %v842_v19, %v364_v42  ;;  %v403_v52 = vadd.f32 %v842_v19, %v402_v40 }
  0xa6   : > { %v385_v47 = vadd.f32 %v842_v19, %v384_v43  ;;  %v423_v53 = vadd.f32 %v842_v19, %v422_v41 }
  0xa7   : > { %v677_v48 = vpack.c.bf16 %v365_v46, %v363_v44 }
  0xa8   : > { %v697_v49 = vpack.c.bf16 %v385_v47, %v383_v45 }
  0xa9   : > { %749 = vst [vmem:[%s853_s25 + $0x8] sm:$0xff] %v677_v48  }
  0xaa   : > { %753 = vst [vmem:[%s853_s25 + $0x28] sm:$0xff] %v697_v49  }
  0xac   : > { %v404_v50 = vpop.f32.mrf.mxu2  ;;  %v367_v56 = vpop.f32.mrf.mxu0 }
  0xad   : > { %v424_v51 = vpop.f32.mrf.mxu3  ;;  %v405_v54 = vadd.f32 %v842_v19, %v404_v50  ;;  %v387_v57 = vpop.f32.mrf.mxu1  ;;  %v368_v0 = vadd.f32 %v842_v19, %v367_v56 }
  0xae   : > { %v425_v55 = vadd.f32 %v842_v19, %v424_v51  ;;  %v388_v1 = vadd.f32 %v842_v19, %v387_v57 }
  0xaf   : > { %v717_v58 = vpack.c.bf16 %v405_v54, %v403_v52 }
  0xb0   : > { %v737_v59 = vpack.c.bf16 %v425_v55, %v423_v53 }
  0xb1   : > { %757 = vst [vmem:[%s853_s25 + $0x48] sm:$0xff] %v717_v58  }
  0xb2   : > { %761 = vst [vmem:[%s853_s25 + $0x68] sm:$0xff] %v737_v59  }
  0xb4   : > { %v407_v60 = vpop.f32.mrf.mxu2  ;;  %v369_v62 = vpop.f32.mrf.mxu0 }
  0xb5   : > { %v427_v61 = vpop.f32.mrf.mxu3  ;;  %v389_v63 = vpop.f32.mrf.mxu1  ;;  %v370_v2 = vadd.f32 %v842_v19, %v369_v62  ;;  %v408_v8 = vadd.f32 %v842_v19, %v407_v60 }
  0xb6   : > { %v390_v3 = vadd.f32 %v842_v19, %v389_v63  ;;  %v428_v9 = vadd.f32 %v842_v19, %v427_v61 }
  0xb7   : > { %v682_v4 = vpack.c.bf16 %v370_v2, %v368_v0 }
  0xb8   : > { %v702_v5 = vpack.c.bf16 %v390_v3, %v388_v1 }
  0xb9   : > { %750 = vst [vmem:[%s853_s25 + $0x10] sm:$0xff] %v682_v4  }
  0xba   : > { %754 = vst [vmem:[%s853_s25 + $0x30] sm:$0xff] %v702_v5  }
  0xbc   : > { %v409_v6 = vpop.f32.mrf.mxu2  ;;  %v372_v12 = vpop.f32.mrf.mxu0 }
  0xbd   : > { %v429_v7 = vpop.f32.mrf.mxu3  ;;  %v410_v10 = vadd.f32 %v842_v19, %v409_v6  ;;  %v392_v13 = vpop.f32.mrf.mxu1  ;;  %v373_v21 = vadd.f32 %v842_v19, %v372_v12 }
  0xbe   : > { %v430_v11 = vadd.f32 %v842_v19, %v429_v7  ;;  %v393_v22 = vadd.f32 %v842_v19, %v392_v13 }
  0xbf   : > { %v722_v14 = vpack.c.bf16 %v410_v10, %v408_v8 }
  0xc0   : > { %v742_v15 = vpack.c.bf16 %v430_v11, %v428_v9 }
  0xc1   : > { %758 = vst [vmem:[%s853_s25 + $0x50] sm:$0xff] %v722_v14  }
  0xc2   : > { %762 = vst [vmem:[%s853_s25 + $0x70] sm:$0xff] %v742_v15  }
  0xc4   : > { %v412_v16 = vpop.f32.mrf.mxu2  ;;  %v374_v18 = vpop.f32.mrf.mxu0 }
  0xc5   : > { %v432_v17 = vpop.f32.mrf.mxu3  ;;  %v394_v20 = vpop.f32.mrf.mxu1  ;;  %v375_v23 = vadd.f32 %v842_v19, %v374_v18  ;;  %v413_v29 = vadd.f32 %v842_v19, %v412_v16 }
  0xc6   : > { %v395_v24 = vadd.f32 %v842_v19, %v394_v20  ;;  %v433_v30 = vadd.f32 %v842_v19, %v432_v17 }
  0xc7   : > { %v687_v25 = vpack.c.bf16 %v375_v23, %v373_v21 }
  0xc8   : > { %v707_v26 = vpack.c.bf16 %v395_v24, %v393_v22 }
  0xc9   : > { %751 = vst [vmem:[%s853_s25 + $0x18] sm:$0xff] %v687_v25  }
  0xca   : > { %755 = vst [vmem:[%s853_s25 + $0x38] sm:$0xff] %v707_v26  }
  0xcc   : > { %v414_v27 = vpop.f32.mrf.mxu2 }
  0xcd   : > { %v434_v28 = vpop.f32.mrf.mxu3  ;;  %v415_v31 = vadd.f32 %v842_v19, %v414_v27 }
  0xce   : > { %v435_v32 = vadd.f32 %v842_v19, %v434_v28 }
  0xcf   : > { %v727_v33 = vpack.c.bf16 %v415_v31, %v413_v29 }
  0xd0   : > { %v747_v34 = vpack.c.bf16 %v435_v32, %v433_v30 }
  0xd1   : > { %759 = vst [vmem:[%s853_s25 + $0x58] sm:$0xff] %v727_v33  }
  0xd2   : > { %763 = vst [vmem:[%s853_s25 + $0x78] sm:$0xff] %v747_v34  }
  0xd3 PF: > { %s13_s12 = sadd.s32 1, %s782_s12  }
  0xd4   : > { %p10_p4 = scmp.ge.s32.totalorder %s13_s12, 4  }
  0xd6   :  { %12 = sbr.rel (!%p10_p4) target bundleno = 1 (0x1), region = 62 }

// kernel: hypergcn_forward.6
= control target key start
LH: loop header
LB: loop body
LE: loop exit
PB: predicated region body
PF: predicated region fallthrough
CT: control target
= control target key end

     0   :  { %s866_s12 = smov 0   ;;  %s987_s0 = inlined_call_operand.vmem [shape: bf16[512,128], index: 0, kind: input, shape index: {}]   ;;  %s988_s1 = inlined_call_operand.vmem [shape: bf16[128,128], index: 1, kind: input, shape index: {}]   ;;  %s989_s2 = inlined_call_operand.vmem [shape: f32[1,128], index: 2, kind: input, shape index: {}]   ;;  %s990_s3 = inlined_call_operand.vmem [shape: bf16[512,128], index: 3, kind: output, shape index: {}]  }
   0x1 LB: > { %s579_s13 = sadd.s32 4294967295, %s844_s12   ;;  %p583_p0 = scmp.ge.s32.totalorder %s844_s12, 1  ;;  %s844_s12 = sphi %s866_s12, %s13_s12  }
   0x2   : > { %p138_p1 = scmp.lt.s32.totalorder %s844_s12, 3 }
   0x4   : > { %p139_p2 = pnand %p583_p0, %p138_p1 }
   0x5   : > { %s584_s22 = sshll.u32 (!%p139_p2), %s579_s13, 5 }
   0x6   : > { %142 = sbr.rel (%p139_p2) target bundleno = 238 (0xee), region = 32  ;;  %p163_p3 = scmp.lt.s32.totalorder (!%p139_p2), %s584_s22, 63 }
   0xb   : > { %v709_v0 = vld [vmem:[%s988_s1 + $0x38] sm:$0xff]  ;;  %v708_v1 = vld [vmem:[%s988_s1 + $0x30] sm:$0xff]  ;;  %v707_v2 = vld [vmem:[%s988_s1 + $0x28] sm:$0xff]  ;;  %s992_s22 = smov (!%p163_p3, %s584_s22), 63 }
   0xc   : > { %370 = vmatpush.bf16.msra.mxu0 %v709_v0  ;;  %805 = vmatpush.bf16.msra.mxu1 %v709_v0  ;;  %v706_v3 = vld [vmem:[%s988_s1 + $0x20] sm:$0xff]  ;;  %v705_v4 = vld [vmem:[%s988_s1 + $0x18] sm:$0xff]  ;;  %v704_v5 = vld [vmem:[%s988_s1 + $0x10] sm:$0xff]  ;;  %s585_s29 = sshll.u32 %s992_s22, 2 }
   0xd   : > { %806 = vmatpush.bf16.msra.mxu2 %v709_v0  ;;  %807 = vmatpush.bf16.msra.mxu3 %v709_v0  ;;  %v703_v6 = vld [vmem:[%s988_s1 + $0x8] sm:$0xff]  ;;  %v702_v7 = vld [vmem:[%s988_s1] sm:$0xff]  ;;  %s906_s7 = scalar_lea.vmem %s987_s0, %s585_s29  ;;  %s938_s13 = scalar_lea.vmem %s990_s3, %s585_s29 }
   0xe   : > { %v686_v8 = vld [vmem:[%s906_s7] sm:$0xff]  ;;  %v687_v12 = vld [vmem:[%s906_s7 + $0x8] sm:$0xff]  ;;  %v688_v16 = vld [vmem:[%s906_s7 + $0x10] sm:$0xff] }
   0xf   : > { %v690_v9 = vld [vmem:[%s906_s7 + $0x20] sm:$0xff]  ;;  %v691_v13 = vld [vmem:[%s906_s7 + $0x28] sm:$0xff]  ;;  %v692_v17 = vld [vmem:[%s906_s7 + $0x30] sm:$0xff] }
  0x10   : > { %371 = vmatpush.bf16.msra.mxu0 %v708_v1  ;;  %808 = vmatpush.bf16.msra.mxu1 %v708_v1  ;;  %v694_v10 = vld [vmem:[%s906_s7 + $0x40] sm:$0xff]  ;;  %v695_v14 = vld [vmem:[%s906_s7 + $0x48] sm:$0xff]  ;;  %v696_v18 = vld [vmem:[%s906_s7 + $0x50] sm:$0xff] }
  0x11   : > { %809 = vmatpush.bf16.msra.mxu2 %v708_v1  ;;  %810 = vmatpush.bf16.msra.mxu3 %v708_v1  ;;  %v698_v11 = vld [vmem:[%s906_s7 + $0x60] sm:$0xff]  ;;  %v699_v15 = vld [vmem:[%s906_s7 + $0x68] sm:$0xff]  ;;  %v700_v19 = vld [vmem:[%s906_s7 + $0x70] sm:$0xff] }
  0x12   : > { %v689_v20 = vld [vmem:[%s906_s7 + $0x18] sm:$0xff]  ;;  %v927_v26 = vld [vmem:[%s989_s2] ss:$0 sm:$0xff] }
  0x13   : > { %v693_v21 = vld [vmem:[%s906_s7 + $0x38] sm:$0xff] }
  0x14   : > { %372 = vmatpush.bf16.msra.mxu0 %v707_v2  ;;  %811 = vmatpush.bf16.msra.mxu1 %v707_v2  ;;  %v697_v22 = vld [vmem:[%s906_s7 + $0x58] sm:$0xff] }
  0x15   : > { %812 = vmatpush.bf16.msra.mxu2 %v707_v2  ;;  %813 = vmatpush.bf16.msra.mxu3 %v707_v2  ;;  %v701_v23 = vld [vmem:[%s906_s7 + $0x78] sm:$0xff] }
  0x18   : > { %373 = vmatpush.bf16.msra.mxu0 %v706_v3  ;;  %814 = vmatpush.bf16.msra.mxu1 %v706_v3 }
  0x19   : > { %815 = vmatpush.bf16.msra.mxu2 %v706_v3  ;;  %816 = vmatpush.bf16.msra.mxu3 %v706_v3 }
  0x1c   : > { %374 = vmatpush.bf16.msra.mxu0 %v705_v4  ;;  %817 = vmatpush.bf16.msra.mxu1 %v705_v4 }
  0x1d   : > { %818 = vmatpush.bf16.msra.mxu2 %v705_v4  ;;  %819 = vmatpush.bf16.msra.mxu3 %v705_v4 }
  0x20   : > { %375 = vmatpush.bf16.msra.mxu0 %v704_v5  ;;  %820 = vmatpush.bf16.msra.mxu1 %v704_v5 }
  0x21   : > { %821 = vmatpush.bf16.msra.mxu2 %v704_v5  ;;  %822 = vmatpush.bf16.msra.mxu3 %v704_v5 }
  0x24   : > { %376 = vmatpush.bf16.msra.mxu0 %v703_v6  ;;  %823 = vmatpush.bf16.msra.mxu1 %v703_v6 }
  0x25   : > { %824 = vmatpush.bf16.msra.mxu2 %v703_v6  ;;  %825 = vmatpush.bf16.msra.mxu3 %v703_v6 }
  0x28   : > { %377 = vmatpush.bf16.msra.mxu0 %v702_v7  ;;  %826 = vmatpush.bf16.msra.mxu1 %v702_v7 }
  0x29   : > { %827 = vmatpush.bf16.msra.mxu2 %v702_v7  ;;  %828 = vmatpush.bf16.msra.mxu3 %v702_v7 }
  0x2b   : > { %378 = vmatmul.bf16.vlgmr.msra.gmra.mxu0 %v686_v8  ;;  %398 = vmatmul.bf16.vlgmr.msra.gmra.mxu1 %v690_v9 }
  0x2c   : > { %418 = vmatmul.bf16.vlgmr.msra.gmra.mxu2 %v694_v10  ;;  %438 = vmatmul.bf16.vlgmr.msra.gmra.mxu3 %v698_v11 }
  0x3b   : > { %383 = vmatmul.bf16.gmra.mxu0 %v687_v12  ;;  %403 = vmatmul.bf16.gmra.mxu1 %v691_v13 }
  0x3c   : > { %423 = vmatmul.bf16.gmra.mxu2 %v695_v14  ;;  %443 = vmatmul.bf16.gmra.mxu3 %v699_v15 }
  0x4b   : > { %388 = vmatmul.bf16.gmra.mxu0 %v688_v16  ;;  %408 = vmatmul.bf16.gmra.mxu1 %v692_v17 }
  0x4c   : > { %428 = vmatmul.bf16.gmra.mxu2 %v696_v18  ;;  %448 = vmatmul.bf16.gmra.mxu3 %v700_v19 }
  0x5b   : > { %393 = vmatmul.bf16.gmra.mxu0 %v689_v20  ;;  %413 = vmatmul.bf16.gmra.mxu1 %v693_v21 }
  0x5c   : > { %433 = vmatmul.bf16.gmra.mxu2 %v697_v22  ;;  %453 = vmatmul.bf16.gmra.mxu3 %v701_v23 }
  0xa8   : > { %v379_v24 = vpop.f32.mrf.mxu0  ;;  %v399_v25 = vpop.f32.mrf.mxu1 }
  0xa9   : > { %v380_v31 = vadd.f32 %v927_v26, %v379_v24  ;;  %v400_v32 = vadd.f32 %v927_v26, %v399_v25 }
  0xaf   : > { %v419_v27 = vpop.f32.mrf.mxu2  ;;  %v439_v28 = vpop.f32.mrf.mxu3 }
  0xb0   : > { %v381_v29 = vpop.f32.mrf.mxu0  ;;  %v401_v30 = vpop.f32.mrf.mxu1  ;;  %v420_v39 = vadd.f32 %v927_v26, %v419_v27  ;;  %v440_v40 = vadd.f32 %v927_v26, %v439_v28 }
  0xb1   : > { %v382_v33 = vadd.f32 %v927_v26, %v381_v29  ;;  %v402_v34 = vadd.f32 %v927_v26, %v401_v30 }
  0xb3   : > { %v713_v35 = vpack.c.bf16 %v382_v33, %v380_v31  ;;  %v733_v36 = vpack.c.bf16 %v402_v34, %v400_v32 }
  0xb5   : > { %714 = vst [vmem:[%s938_s13] sm:$0xff] %v713_v35  }
  0xb6   : > { %793 = vst [vmem:[%s938_s13 + $0x20] sm:$0xff] %v733_v36  }
  0xb7   : > { %v421_v37 = vpop.f32.mrf.mxu2  ;;  %v441_v38 = vpop.f32.mrf.mxu3 }
  0xb8   : > { %v422_v41 = vadd.f32 %v927_v26, %v421_v37  ;;  %v442_v42 = vadd.f32 %v927_v26, %v441_v38  ;;  %v384_v43 = vpop.f32.mrf.mxu0  ;;  %v404_v44 = vpop.f32.mrf.mxu1 }
  0xb9   : > { %v385_v51 = vadd.f32 %v927_v26, %v384_v43  ;;  %v405_v52 = vadd.f32 %v927_v26, %v404_v44 }
  0xba   : > { %v753_v45 = vpack.c.bf16 %v422_v41, %v420_v39  ;;  %v773_v46 = vpack.c.bf16 %v442_v42, %v440_v40 }
  0xbc   : > { %797 = vst [vmem:[%s938_s13 + $0x40] sm:$0xff] %v753_v45  }
  0xbd   : > { %801 = vst [vmem:[%s938_s13 + $0x60] sm:$0xff] %v773_v46  }
  0xbf   : > { %v424_v47 = vpop.f32.mrf.mxu2  ;;  %v444_v48 = vpop.f32.mrf.mxu3 }
  0xc0   : > { %v386_v49 = vpop.f32.mrf.mxu0  ;;  %v406_v50 = vpop.f32.mrf.mxu1  ;;  %v425_v59 = vadd.f32 %v927_v26, %v424_v47  ;;  %v445_v60 = vadd.f32 %v927_v26, %v444_v48 }
  0xc1   : > { %v387_v53 = vadd.f32 %v927_v26, %v386_v49  ;;  %v407_v54 = vadd.f32 %v927_v26, %v406_v50 }
  0xc3   : > { %v718_v55 = vpack.c.bf16 %v387_v53, %v385_v51  ;;  %v738_v56 = vpack.c.bf16 %v407_v54, %v405_v52 }
  0xc5   : > { %790 = vst [vmem:[%s938_s13 + $0x8] sm:$0xff] %v718_v55  }
  0xc6   : > { %794 = vst [vmem:[%s938_s13 + $0x28] sm:$0xff] %v738_v56  }
  0xc7   : > { %v426_v57 = vpop.f32.mrf.mxu2  ;;  %v446_v58 = vpop.f32.mrf.mxu3 }
  0xc8   : > { %v427_v61 = vadd.f32 %v927_v26, %v426_v57  ;;  %v447_v62 = vadd.f32 %v927_v26, %v446_v58  ;;  %v389_v63 = vpop.f32.mrf.mxu0  ;;  %v409_v0 = vpop.f32.mrf.mxu1 }
  0xc9   : > { %v390_v7 = vadd.f32 %v927_v26, %v389_v63  ;;  %v410_v8 = vadd.f32 %v927_v26, %v409_v0 }
  0xca   : > { %v758_v1 = vpack.c.bf16 %v427_v61, %v425_v59  ;;  %v778_v2 = vpack.c.bf16 %v447_v62, %v445_v60 }
  0xcc   : > { %798 = vst [vmem:[%s938_s13 + $0x48] sm:$0xff] %v758_v1  }
  0xcd   : > { %802 = vst [vmem:[%s938_s13 + $0x68] sm:$0xff] %v778_v2  }
  0xcf   : > { %v429_v3 = vpop.f32.mrf.mxu2  ;;  %v449_v4 = vpop.f32.mrf.mxu3 }
  0xd0   : > { %v391_v5 = vpop.f32.mrf.mxu0  ;;  %v411_v6 = vpop.f32.mrf.mxu1  ;;  %v430_v15 = vadd.f32 %v927_v26, %v429_v3  ;;  %v450_v16 = vadd.f32 %v927_v26, %v449_v4 }
  0xd1   : > { %v392_v9 = vadd.f32 %v927_v26, %v391_v5  ;;  %v412_v10 = vadd.f32 %v927_v26, %v411_v6 }
  0xd3   : > { %v723_v11 = vpack.c.bf16 %v392_v9, %v390_v7  ;;  %v743_v12 = vpack.c.bf16 %v412_v10, %v410_v8 }
  0xd5   : > { %791 = vst [vmem:[%s938_s13 + $0x10] sm:$0xff] %v723_v11  }
  0xd6   : > { %795 = vst [vmem:[%s938_s13 + $0x30] sm:$0xff] %v743_v12  }
  0xd7   : > { %v431_v13 = vpop.f32.mrf.mxu2  ;;  %v451_v14 = vpop.f32.mrf.mxu3 }
  0xd8   : > { %v432_v17 = vadd.f32 %v927_v26, %v431_v13  ;;  %v452_v18 = vadd.f32 %v927_v26, %v451_v14  ;;  %v394_v19 = vpop.f32.mrf.mxu0  ;;  %v414_v20 = vpop.f32.mrf.mxu1 }
  0xd9   : > { %v395_v28 = vadd.f32 %v927_v26, %v394_v19  ;;  %v415_v29 = vadd.f32 %v927_v26, %v414_v20 }
  0xda   : > { %v763_v21 = vpack.c.bf16 %v432_v17, %v430_v15  ;;  %v783_v22 = vpack.c.bf16 %v452_v18, %v450_v16 }
  0xdc   : > { %799 = vst [vmem:[%s938_s13 + $0x50] sm:$0xff] %v763_v21  }
  0xdd   : > { %803 = vst [vmem:[%s938_s13 + $0x70] sm:$0xff] %v783_v22  }
  0xdf   : > { %v434_v23 = vpop.f32.mrf.mxu2  ;;  %v454_v24 = vpop.f32.mrf.mxu3 }
  0xe0   : > { %v396_v25 = vpop.f32.mrf.mxu0  ;;  %v416_v27 = vpop.f32.mrf.mxu1  ;;  %v435_v36 = vadd.f32 %v927_v26, %v434_v23  ;;  %v455_v37 = vadd.f32 %v927_v26, %v454_v24 }
  0xe1   : > { %v397_v30 = vadd.f32 %v927_v26, %v396_v25  ;;  %v417_v31 = vadd.f32 %v927_v26, %v416_v27 }
  0xe3   : > { %v728_v32 = vpack.c.bf16 %v397_v30, %v395_v28  ;;  %v748_v33 = vpack.c.bf16 %v417_v31, %v415_v29 }
  0xe5   : > { %792 = vst [vmem:[%s938_s13 + $0x18] sm:$0xff] %v728_v32  }
  0xe6   : > { %796 = vst [vmem:[%s938_s13 + $0x38] sm:$0xff] %v748_v33  }
  0xe7   : > { %v436_v34 = vpop.f32.mrf.mxu2  ;;  %v456_v35 = vpop.f32.mrf.mxu3 }
  0xe8   : > { %v437_v38 = vadd.f32 %v927_v26, %v436_v34  ;;  %v457_v39 = vadd.f32 %v927_v26, %v456_v35 }
  0xea   : > { %v768_v40 = vpack.c.bf16 %v437_v38, %v435_v36  ;;  %v788_v41 = vpack.c.bf16 %v457_v39, %v455_v37 }
  0xec   : > { %800 = vst [vmem:[%s938_s13 + $0x58] sm:$0xff] %v768_v40  }
  0xed   : > { %804 = vst [vmem:[%s938_s13 + $0x78] sm:$0xff] %v788_v41  }
  0xee PF: > { %s13_s12 = sadd.s32 1, %s844_s12  }
  0xef   : > { %p10_p4 = scmp.ge.s32.totalorder %s13_s12, 4  }
  0xf1   :  { %12 = sbr.rel (!%p10_p4) target bundleno = 1 (0x1), region = 62 }

// kernel: hypergcn_forward.5
= control target key start
LH: loop header
LB: loop body
LE: loop exit
PB: predicated region body
PF: predicated region fallthrough
CT: control target
= control target key end

     0   :  { %s2166_s9 = smov 0   ;;  %s2168_s10 = smov 0   ;;  %s2450_s0 = inlined_call_operand.vmem [shape: bf16[512,512], index: 0, kind: input, shape index: {}]   ;;  %s2451_s1 = inlined_call_operand.vmem [shape: bf16[512,128], index: 1, kind: input, shape index: {}]   ;;  %s2452_s2 = inlined_call_operand.vmem [shape: bf16[512,128], index: 2, kind: output, shape index: {}]  }
   0x1   :  { %s2170_s11 = smov 0  }
   0x2 LB: > { %s24_s12 = sadd.s32 1, %s2145_s10  ;;  %p1519_p0 = scmp.ge.s32.totalorder %s2149_s11, 1  ;;  %s2149_s11 = sphi %s2170_s11, %s12_s11   ;;  %s2145_s10 = sphi %s2168_s10, %s2454_s10   ;;  %s2141_s9 = sphi %s2166_s9, %s2453_s9  }
   0x3   : > { %p26_p1 = scmp.ge.s32.totalorder %s24_s12, 2  ;;  %p133_p2 = scmp.lt.s32.totalorder %s2149_s11, 3 }
   0x5   : > { %s2456_s12 = smov (%p26_p1, %s24_s12), 0  ;;  %p134_p3 = pnand %p1519_p0, %p133_p2 }
   0x6   : > { %s1520_s13 = sshll.u32 (!%p134_p3), %s2141_s9, 5 }
   0x7   : > { %137 = sbr.rel (%p134_p3) target bundleno = 435 (0x1b3), region = 28  ;;  %p162_p4 = scmp.lt.s32.totalorder (!%p134_p3), %s1520_s13, 63 }
   0xc   : > { %v1919_v0 = vld [vmem:[%s2451_s1 + $0x38] sm:$0xff]  ;;  %v1918_v4 = vld [vmem:[%s2451_s1 + $0x30] sm:$0xff]  ;;  %v1917_v8 = vld [vmem:[%s2451_s1 + $0x28] sm:$0xff]  ;;  %s2458_s13 = smov (!%p162_p4, %s1520_s13), 63 }
   0xd   : > { %v1927_v1 = vld [vmem:[%s2451_s1 + $0x78] sm:$0xff]  ;;  %891 = vmatpush.bf16.msra.mxu0 %v1919_v0  ;;  %v1926_v5 = vld [vmem:[%s2451_s1 + $0x70] sm:$0xff]  ;;  %v1925_v9 = vld [vmem:[%s2451_s1 + $0x68] sm:$0xff]  ;;  %s1911_s14 = sshll.u32 %s2458_s13, 4  ;;  %s1524_s5 = sshll.u32 %s2458_s13, 2 }
   0xe   : > { %v1935_v2 = vld [vmem:[%s2451_s1 + $0xb8] sm:$0xff]  ;;  %980 = vmatpush.bf16.msra.mxu1 %v1927_v1  ;;  %v1934_v6 = vld [vmem:[%s2451_s1 + $0xb0] sm:$0xff]  ;;  %v1933_v10 = vld [vmem:[%s2451_s1 + $0xa8] sm:$0xff]  ;;  %s2271_s21 = scalar_lea.vmem %s2450_s0, %s1911_s14  ;;  %s2375_s8 = scalar_lea.vmem %s2452_s2, %s1524_s5 }
   0xf   : > { %v1943_v3 = vld [vmem:[%s2451_s1 + $0xf8] sm:$0xff]  ;;  %1069 = vmatpush.bf16.msra.mxu2 %v1935_v2  ;;  %v1942_v7 = vld [vmem:[%s2451_s1 + $0xf0] sm:$0xff]  ;;  %v1941_v11 = vld [vmem:[%s2451_s1 + $0xe8] sm:$0xff] }
  0x10   : > { %1158 = vmatpush.bf16.msra.mxu3 %v1943_v3  ;;  %v1916_v12 = vld [vmem:[%s2451_s1 + $0x20] sm:$0xff]  ;;  %v1915_v16 = vld [vmem:[%s2451_s1 + $0x18] sm:$0xff]  ;;  %v1914_v20 = vld [vmem:[%s2451_s1 + $0x10] sm:$0xff] }
  0x11   : > { %892 = vmatpush.bf16.msra.mxu0 %v1918_v4  ;;  %v1924_v13 = vld [vmem:[%s2451_s1 + $0x60] sm:$0xff]  ;;  %v1923_v17 = vld [vmem:[%s2451_s1 + $0x58] sm:$0xff]  ;;  %v1922_v21 = vld [vmem:[%s2451_s1 + $0x50] sm:$0xff] }
  0x12   : > { %981 = vmatpush.bf16.msra.mxu1 %v1926_v5  ;;  %v1932_v14 = vld [vmem:[%s2451_s1 + $0xa0] sm:$0xff]  ;;  %v1931_v18 = vld [vmem:[%s2451_s1 + $0x98] sm:$0xff]  ;;  %v1930_v22 = vld [vmem:[%s2451_s1 + $0x90] sm:$0xff] }
  0x13   : > { %1070 = vmatpush.bf16.msra.mxu2 %v1934_v6  ;;  %v1940_v15 = vld [vmem:[%s2451_s1 + $0xe0] sm:$0xff]  ;;  %v1939_v19 = vld [vmem:[%s2451_s1 + $0xd8] sm:$0xff]  ;;  %v1938_v23 = vld [vmem:[%s2451_s1 + $0xd0] sm:$0xff] }
  0x14   : > { %1159 = vmatpush.bf16.msra.mxu3 %v1942_v7  ;;  %v1913_v24 = vld [vmem:[%s2451_s1 + $0x8] sm:$0xff]  ;;  %v1912_v28 = vld [vmem:[%s2451_s1] sm:$0xff]  ;;  %v1946_v33 = vld [vmem:[%s2271_s21 + $0xc] sm:$0xf0] }
  0x15   : > { %893 = vmatpush.bf16.msra.mxu0 %v1917_v8  ;;  %v1921_v25 = vld [vmem:[%s2451_s1 + $0x48] sm:$0xff]  ;;  %v1920_v29 = vld [vmem:[%s2451_s1 + $0x40] sm:$0xff]  ;;  %v1529_v35 = vld [vmem:[%s2271_s21 + $0x10] sm:$0xf0] }
  0x16   : > { %982 = vmatpush.bf16.msra.mxu1 %v1925_v9  ;;  %v1929_v26 = vld [vmem:[%s2451_s1 + $0x88] sm:$0xff]  ;;  %v1928_v30 = vld [vmem:[%s2451_s1 + $0x80] sm:$0xff]  ;;  %v1947_v37 = vld [vmem:[%s2271_s21 + $0x14] sm:$0xf0] }
  0x17   : > { %1071 = vmatpush.bf16.msra.mxu2 %v1933_v10  ;;  %v1937_v27 = vld [vmem:[%s2451_s1 + $0xc8] sm:$0xff]  ;;  %v1936_v31 = vld [vmem:[%s2451_s1 + $0xc0] sm:$0xff]  ;;  %v1537_v39 = vld [vmem:[%s2271_s21 + $0x18] sm:$0xf0] }
  0x18   : > { %1160 = vmatpush.bf16.msra.mxu3 %v1941_v11  ;;  %v1527_v32 = vld [vmem:[%s2271_s21] sm:$0xf]  ;;  %v1944_v34 = vld [vmem:[%s2271_s21 + $0x4] sm:$0xf]  ;;  %v1535_v36 = vld [vmem:[%s2271_s21 + $0x8] sm:$0xf] }
  0x19   : > { %894 = vmatpush.bf16.msra.mxu0 %v1916_v12  ;;  %v1945_v38 = vld [vmem:[%s2271_s21 + $0xc] sm:$0xf]  ;;  %v1528_v40 = vor.u32 %v1946_v33, %v1527_v32  ;;  %v1532_v41 = vor.u32 %v1944_v34, %v1529_v35  ;;  %v1536_v42 = vor.u32 %v1947_v37, %v1535_v36  ;;  %v1543_v44 = vld [vmem:[%s2271_s21 + $0x20] sm:$0xf]  ;;  %v1950_v45 = vld [vmem:[%s2271_s21 + $0x2c] sm:$0xf0] }
  0x1a   : > { %983 = vmatpush.bf16.msra.mxu1 %v1924_v13  ;;  %v1540_v43 = vor.u32 %v1945_v38, %v1537_v39  ;;  %v1948_v46 = vld [vmem:[%s2271_s21 + $0x24] sm:$0xf]  ;;  %v1545_v47 = vld [vmem:[%s2271_s21 + $0x30] sm:$0xf0]  ;;  %v1551_v48 = vld [vmem:[%s2271_s21 + $0x28] sm:$0xf]  ;;  %v1544_v52 = vor.u32 %v1950_v45, %v1543_v44 }
  0x1b   : > { %1072 = vmatpush.bf16.msra.mxu2 %v1932_v14  ;;  %v1951_v49 = vld [vmem:[%s2271_s21 + $0x34] sm:$0xf0]  ;;  %v1949_v50 = vld [vmem:[%s2271_s21 + $0x2c] sm:$0xf]  ;;  %v1553_v51 = vld [vmem:[%s2271_s21 + $0x38] sm:$0xf0]  ;;  %v1548_v53 = vor.u32 %v1948_v46, %v1545_v47 }
  0x1c   : > { %1161 = vmatpush.bf16.msra.mxu3 %v1940_v15  ;;  %v1552_v54 = vor.u32 %v1951_v49, %v1551_v48  ;;  %v1556_v55 = vor.u32 %v1949_v50, %v1553_v51  ;;  %v1559_v56 = vld [vmem:[%s2271_s21 + $0x40] sm:$0xf]  ;;  %v1954_v57 = vld [vmem:[%s2271_s21 + $0x4c] sm:$0xf0]  ;;  %v1952_v58 = vld [vmem:[%s2271_s21 + $0x44] sm:$0xf] }
  0x1d   : > { %895 = vmatpush.bf16.msra.mxu0 %v1915_v16  ;;  %v1561_v59 = vld [vmem:[%s2271_s21 + $0x50] sm:$0xf0]  ;;  %v1567_v60 = vld [vmem:[%s2271_s21 + $0x48] sm:$0xf]  ;;  %v1955_v61 = vld [vmem:[%s2271_s21 + $0x54] sm:$0xf0]  ;;  %v1560_v0 = vor.u32 %v1954_v57, %v1559_v56 }
  0x1e   : > { %984 = vmatpush.bf16.msra.mxu1 %v1923_v17  ;;  %v1953_v62 = vld [vmem:[%s2271_s21 + $0x4c] sm:$0xf]  ;;  %v1569_v63 = vld [vmem:[%s2271_s21 + $0x58] sm:$0xf0]  ;;  %v1564_v1 = vor.u32 %v1952_v58, %v1561_v59  ;;  %v1568_v2 = vor.u32 %v1955_v61, %v1567_v60  ;;  %v1575_v4 = vld [vmem:[%s2271_s21 + $0x60] sm:$0xf] }
  0x1f   : > { %1073 = vmatpush.bf16.msra.mxu2 %v1931_v18  ;;  %v1572_v3 = vor.u32 %v1953_v62, %v1569_v63  ;;  %v1958_v5 = vld [vmem:[%s2271_s21 + $0x6c] sm:$0xf0]  ;;  %v1956_v6 = vld [vmem:[%s2271_s21 + $0x64] sm:$0xf]  ;;  %v1577_v7 = vld [vmem:[%s2271_s21 + $0x70] sm:$0xf0] }
  0x20   : > { %1162 = vmatpush.bf16.msra.mxu3 %v1939_v19  ;;  %v1583_v8 = vld [vmem:[%s2271_s21 + $0x68] sm:$0xf]  ;;  %v1959_v9 = vld [vmem:[%s2271_s21 + $0x74] sm:$0xf0]  ;;  %v1957_v10 = vld [vmem:[%s2271_s21 + $0x6c] sm:$0xf]  ;;  %v1576_v12 = vor.u32 %v1958_v5, %v1575_v4  ;;  %v1580_v13 = vor.u32 %v1956_v6, %v1577_v7 }
  0x21   : > { %896 = vmatpush.bf16.msra.mxu0 %v1914_v20  ;;  %v1585_v11 = vld [vmem:[%s2271_s21 + $0x78] sm:$0xf0]  ;;  %v1584_v14 = vor.u32 %v1959_v9, %v1583_v8  ;;  %v1591_v16 = vld [vmem:[%s2271_s21 + $0x80] sm:$0xf]  ;;  %v1962_v17 = vld [vmem:[%s2271_s21 + $0x8c] sm:$0xf0] }
  0x22   : > { %985 = vmatpush.bf16.msra.mxu1 %v1922_v21  ;;  %v1588_v15 = vor.u32 %v1957_v10, %v1585_v11  ;;  %v1960_v18 = vld [vmem:[%s2271_s21 + $0x84] sm:$0xf]  ;;  %v1593_v19 = vld [vmem:[%s2271_s21 + $0x90] sm:$0xf0]  ;;  %v1599_v20 = vld [vmem:[%s2271_s21 + $0x88] sm:$0xf] }
  0x23   : > { %1074 = vmatpush.bf16.msra.mxu2 %v1930_v22  ;;  %v1963_v21 = vld [vmem:[%s2271_s21 + $0x94] sm:$0xf0]  ;;  %v1961_v22 = vld [vmem:[%s2271_s21 + $0x8c] sm:$0xf]  ;;  %v1615_v32 = vld [vmem:[%s2271_s21 + $0xa8] sm:$0xf] }
  0x24   : > { %1163 = vmatpush.bf16.msra.mxu3 %v1938_v23  ;;  %v1601_v23 = vld [vmem:[%s2271_s21 + $0x98] sm:$0xf0]  ;;  %v1967_v33 = vld [vmem:[%s2271_s21 + $0xb4] sm:$0xf0]  ;;  %v1965_v34 = vld [vmem:[%s2271_s21 + $0xac] sm:$0xf] }
  0x25   : > { %897 = vmatpush.bf16.msra.mxu0 %v1913_v24  ;;  %v1592_v24 = vor.u32 %v1962_v17, %v1591_v16  ;;  %v1617_v35 = vld [vmem:[%s2271_s21 + $0xb8] sm:$0xf0]  ;;  %v1616_v38 = vor.u32 %v1967_v33, %v1615_v32  ;;  %v1631_v44 = vld [vmem:[%s2271_s21 + $0xc8] sm:$0xf]  ;;  %v1971_v45 = vld [vmem:[%s2271_s21 + $0xd4] sm:$0xf0] }
  0x26   : > { %986 = vmatpush.bf16.msra.mxu1 %v1921_v25  ;;  %v1596_v25 = vor.u32 %v1960_v18, %v1593_v19  ;;  %v1620_v39 = vor.u32 %v1965_v34, %v1617_v35  ;;  %v1969_v46 = vld [vmem:[%s2271_s21 + $0xcc] sm:$0xf]  ;;  %v1633_v47 = vld [vmem:[%s2271_s21 + $0xd8] sm:$0xf0]  ;;  %v1632_v50 = vor.u32 %v1971_v45, %v1631_v44  ;;  %v1647_v56 = vld [vmem:[%s2271_s21 + $0xe8] sm:$0xf] }
  0x27   : > { %1075 = vmatpush.bf16.msra.mxu2 %v1929_v26  ;;  %v1600_v26 = vor.u32 %v1963_v21, %v1599_v20  ;;  %v1636_v51 = vor.u32 %v1969_v46, %v1633_v47  ;;  %v1975_v57 = vld [vmem:[%s2271_s21 + $0xf4] sm:$0xf0]  ;;  %v1973_v58 = vld [vmem:[%s2271_s21 + $0xec] sm:$0xf]  ;;  %v1649_v59 = vld [vmem:[%s2271_s21 + $0xf8] sm:$0xf0] }
  0x28   : > { %1164 = vmatpush.bf16.msra.mxu3 %v1937_v27  ;;  %v1604_v27 = vor.u32 %v1961_v22, %v1601_v23  ;;  %v1648_v62 = vor.u32 %v1975_v57, %v1647_v56  ;;  %v1652_v63 = vor.u32 %v1973_v58, %v1649_v59  ;;  %v1663_v4 = vld [vmem:[%s2271_s21 + $0x108] sm:$0xf]  ;;  %v1979_v5 = vld [vmem:[%s2271_s21 + $0x114] sm:$0xf0]  ;;  %v1977_v6 = vld [vmem:[%s2271_s21 + $0x10c] sm:$0xf] }
  0x29   : > { %898 = vmatpush.bf16.msra.mxu0 %v1912_v28  ;;  %v1607_v28 = vld [vmem:[%s2271_s21 + $0xa0] sm:$0xf]  ;;  %v1665_v7 = vld [vmem:[%s2271_s21 + $0x118] sm:$0xf0]  ;;  %v1982_v20 = vld [vmem:[%s2271_s21 + $0x12c] sm:$0xf0] }
  0x2a   : > { %987 = vmatpush.bf16.msra.mxu1 %v1920_v29  ;;  %v1966_v29 = vld [vmem:[%s2271_s21 + $0xac] sm:$0xf0]  ;;  %v1671_v19 = vld [vmem:[%s2271_s21 + $0x120] sm:$0xf]  ;;  %v1980_v22 = vld [vmem:[%s2271_s21 + $0x124] sm:$0xf] }
  0x2b   : > { %1076 = vmatpush.bf16.msra.mxu2 %v1928_v30  ;;  %v1964_v30 = vld [vmem:[%s2271_s21 + $0xa4] sm:$0xf]  ;;  %v1608_v36 = vor.u32 %v1966_v29, %v1607_v28  ;;  %v1673_v23 = vld [vmem:[%s2271_s21 + $0x130] sm:$0xf0]  ;;  %v1697_v56 = vld [vmem:[%s2271_s21 + $0x158] sm:$0xf0] }
  0x2c   : > { %1165 = vmatpush.bf16.msra.mxu3 %v1936_v31  ;;  %899 = vmatmul.bf16.vlgmr.msra.gmra.mxu0 %v1528_v40  ;;  %v1609_v31 = vld [vmem:[%s2271_s21 + $0xb0] sm:$0xf0]  ;;  %v1623_v40 = vld [vmem:[%s2271_s21 + $0xc0] sm:$0xf]  ;;  %v1676_v32 = vor.u32 %v1980_v22, %v1673_v23 }
  0x2d   : > { %988 = vmatmul.bf16.vlgmr.msra.gmra.mxu1 %v1532_v41  ;;  %v1612_v37 = vor.u32 %v1964_v30, %v1609_v31  ;;  %v1970_v41 = vld [vmem:[%s2271_s21 + $0xcc] sm:$0xf0]  ;;  %v1672_v31 = vor.u32 %v1982_v20, %v1671_v19  ;;  %v1991_v19 = vld [vmem:[%s2271_s21 + $0x174] sm:$0xf0]  ;;  %v1989_v20 = vld [vmem:[%s2271_s21 + $0x16c] sm:$0xf] }
  0x2e   : > { %1077 = vmatmul.bf16.vlgmr.msra.gmra.mxu2 %v1536_v42  ;;  %v1968_v42 = vld [vmem:[%s2271_s21 + $0xc4] sm:$0xf]  ;;  %v1624_v48 = vor.u32 %v1970_v41, %v1623_v40 }
  0x2f   : > { %1166 = vmatmul.bf16.vlgmr.msra.gmra.mxu3 %v1540_v43  ;;  %v1625_v43 = vld [vmem:[%s2271_s21 + $0xd0] sm:$0xf0] }
  0x30   : > { %v1628_v49 = vor.u32 %v1968_v42, %v1625_v43 }
  0x3c   : > { %904 = vmatmul.bf16.gmra.mxu0 %v1544_v52  ;;  %v1639_v52 = vld [vmem:[%s2271_s21 + $0xe0] sm:$0xf] }
  0x3d   : > { %993 = vmatmul.bf16.gmra.mxu1 %v1548_v53  ;;  %v1974_v53 = vld [vmem:[%s2271_s21 + $0xec] sm:$0xf0] }
  0x3e   : > { %1082 = vmatmul.bf16.gmra.mxu2 %v1552_v54  ;;  %v1972_v54 = vld [vmem:[%s2271_s21 + $0xe4] sm:$0xf]  ;;  %v1640_v60 = vor.u32 %v1974_v53, %v1639_v52  ;;  %v1689_v52 = vld [vmem:[%s2271_s21 + $0x150] sm:$0xf0]  ;;  %v1695_v53 = vld [vmem:[%s2271_s21 + $0x148] sm:$0xf] }
  0x3f   : > { %1171 = vmatmul.bf16.gmra.mxu3 %v1556_v55  ;;  %v1641_v55 = vld [vmem:[%s2271_s21 + $0xf0] sm:$0xf0] }
  0x40   : > { %v1644_v61 = vor.u32 %v1972_v54, %v1641_v55  ;;  %v1987_v54 = vld [vmem:[%s2271_s21 + $0x154] sm:$0xf0]  ;;  %v1985_v55 = vld [vmem:[%s2271_s21 + $0x14c] sm:$0xf] }
  0x4c   : > { %909 = vmatmul.bf16.gmra.mxu0 %v1560_v0  ;;  %v1655_v0 = vld [vmem:[%s2271_s21 + $0x100] sm:$0xf] }
  0x4d   : > { %998 = vmatmul.bf16.gmra.mxu1 %v1564_v1  ;;  %v1978_v1 = vld [vmem:[%s2271_s21 + $0x10c] sm:$0xf0] }
  0x4e   : > { %1087 = vmatmul.bf16.gmra.mxu2 %v1568_v2  ;;  %v1976_v2 = vld [vmem:[%s2271_s21 + $0x104] sm:$0xf]  ;;  %v1656_v8 = vor.u32 %v1978_v1, %v1655_v0 }
  0x4f   : > { %1176 = vmatmul.bf16.gmra.mxu3 %v1572_v3  ;;  %v1657_v3 = vld [vmem:[%s2271_s21 + $0x110] sm:$0xf0] }
  0x50   : > { %v1660_v9 = vor.u32 %v1976_v2, %v1657_v3  ;;  %v1696_v2 = vor.u32 %v1987_v54, %v1695_v53  ;;  %v1700_v3 = vor.u32 %v1985_v55, %v1697_v56 }
  0x5c   : > { %914 = vmatmul.bf16.gmra.mxu0 %v1576_v12  ;;  %v1664_v12 = vor.u32 %v1979_v5, %v1663_v4 }
  0x5d   : > { %1003 = vmatmul.bf16.gmra.mxu1 %v1580_v13  ;;  %v1668_v13 = vor.u32 %v1977_v6, %v1665_v7 }
  0x5e   : > { %1092 = vmatmul.bf16.gmra.mxu2 %v1584_v14 }
  0x5f   : > { %1181 = vmatmul.bf16.gmra.mxu3 %v1588_v15 }
  0x6c   : > { %919 = vmatmul.bf16.gmra.mxu0 %v1592_v24  ;;  %v1679_v24 = vld [vmem:[%s2271_s21 + $0x128] sm:$0xf] }
  0x6d   : > { %1008 = vmatmul.bf16.gmra.mxu1 %v1596_v25  ;;  %v1983_v25 = vld [vmem:[%s2271_s21 + $0x134] sm:$0xf0] }
  0x6e   : > { %1097 = vmatmul.bf16.gmra.mxu2 %v1600_v26  ;;  %v1981_v26 = vld [vmem:[%s2271_s21 + $0x12c] sm:$0xf] }
  0x6f   : > { %1186 = vmatmul.bf16.gmra.mxu3 %v1604_v27  ;;  %v1681_v27 = vld [vmem:[%s2271_s21 + $0x138] sm:$0xf0] }
  0x7c   : > { %924 = vmatmul.bf16.gmra.mxu0 %v1608_v36 }
  0x7d   : > { %1013 = vmatmul.bf16.gmra.mxu1 %v1612_v37  ;;  %v1680_v37 = vor.u32 %v1983_v25, %v1679_v24 }
  0x7e   : > { %1102 = vmatmul.bf16.gmra.mxu2 %v1616_v38  ;;  %v1684_v38 = vor.u32 %v1981_v26, %v1681_v27 }
  0x7f   : > { %1191 = vmatmul.bf16.gmra.mxu3 %v1620_v39 }
  0x8c   : > { %929 = vmatmul.bf16.gmra.mxu0 %v1624_v48  ;;  %v1687_v48 = vld [vmem:[%s2271_s21 + $0x140] sm:$0xf] }
  0x8d   : > { %1018 = vmatmul.bf16.gmra.mxu1 %v1628_v49  ;;  %v1986_v49 = vld [vmem:[%s2271_s21 + $0x14c] sm:$0xf0] }
  0x8e   : > { %1107 = vmatmul.bf16.gmra.mxu2 %v1632_v50 }
  0x8f   : > { %1196 = vmatmul.bf16.gmra.mxu3 %v1636_v51  ;;  %v1984_v51 = vld [vmem:[%s2271_s21 + $0x144] sm:$0xf] }
  0x9c   : > { %934 = vmatmul.bf16.gmra.mxu0 %v1640_v60  ;;  %v1688_v60 = vor.u32 %v1986_v49, %v1687_v48  ;;  %v1995_v48 = vld [vmem:[%s2271_s21 + $0x194] sm:$0xf0]  ;;  %v1993_v49 = vld [vmem:[%s2271_s21 + $0x18c] sm:$0xf] }
  0x9d   : > { %1023 = vmatmul.bf16.gmra.mxu1 %v1644_v61  ;;  %v1692_v61 = vor.u32 %v1984_v51, %v1689_v52 }
  0x9e   : > { %1112 = vmatmul.bf16.gmra.mxu2 %v1648_v62 }
  0x9f   : > { %1201 = vmatmul.bf16.gmra.mxu3 %v1652_v63 }
  0xa9   : > { %v900_v10 = vpop.f32.mrf.mxu0 }
  0xaa   : > { %v989_v11 = vpop.f32.mrf.mxu1 }
  0xab   : > { %v990_v16 = vadd.f32 %v989_v11, %v900_v10 }
  0xac   : > { %939 = vmatmul.bf16.gmra.mxu0 %v1656_v8 }
  0xad   : > { %1028 = vmatmul.bf16.gmra.mxu1 %v1660_v9 }
  0xae   : > { %1117 = vmatmul.bf16.gmra.mxu2 %v1664_v12 }
  0xaf   : > { %1206 = vmatmul.bf16.gmra.mxu3 %v1668_v13  ;;  %v1703_v13 = vld [vmem:[%s2271_s21 + $0x160] sm:$0xf] }
  0xb1   : > { %v1078_v14 = vpop.f32.mrf.mxu2  ;;  %v902_v17 = vpop.f32.mrf.mxu0 }
  0xb2   : > { %v1167_v15 = vpop.f32.mrf.mxu3  ;;  %v991_v18 = vpop.f32.mrf.mxu1  ;;  %v1079_v21 = vadd.f32 %v1078_v14, %v990_v16  ;;  %v1990_v14 = vld [vmem:[%s2271_s21 + $0x16c] sm:$0xf0]  ;;  %v1988_v16 = vld [vmem:[%s2271_s21 + $0x164] sm:$0xf] }
  0xb3   : > { %v992_v28 = vadd.f32 %v991_v18, %v902_v17  ;;  %v1705_v17 = vld [vmem:[%s2271_s21 + $0x170] sm:$0xf0]  ;;  %v1711_v18 = vld [vmem:[%s2271_s21 + $0x168] sm:$0xf]  ;;  %v1704_v25 = vor.u32 %v1990_v14, %v1703_v13  ;;  %v1999_v13 = vld [vmem:[%s2271_s21 + $0x1b4] sm:$0xf0] }
  0xb4   : > { %v1168_v33 = vadd.f32 %v1167_v15, %v1079_v21  ;;  %v1713_v21 = vld [vmem:[%s2271_s21 + $0x178] sm:$0xf0]  ;;  %v1708_v26 = vor.u32 %v1988_v16, %v1705_v17  ;;  %v1997_v14 = vld [vmem:[%s2271_s21 + $0x1ac] sm:$0xf] }
  0xb6   : > { %v1346_v40 = vmax.f32 %v1168_v33, 0.0 }
  0xb9   : > { %v1080_v29 = vpop.f32.mrf.mxu2  ;;  %v905_v35 = vpop.f32.mrf.mxu0 }
  0xba   : > { %v1169_v30 = vpop.f32.mrf.mxu3  ;;  %v1081_v34 = vadd.f32 %v1080_v29, %v992_v28  ;;  %v994_v36 = vpop.f32.mrf.mxu1 }
  0xbb   : > { %v995_v45 = vadd.f32 %v994_v36, %v905_v35 }
  0xbc   : > { %v1170_v39 = vadd.f32 %v1169_v30, %v1081_v34  ;;  %944 = vmatmul.bf16.gmra.mxu0 %v1672_v31  ;;  %v1712_v31 = vor.u32 %v1991_v19, %v1711_v18 }
  0xbd   : > { %1033 = vmatmul.bf16.gmra.mxu1 %v1676_v32  ;;  %v1716_v32 = vor.u32 %v1989_v20, %v1713_v21 }
  0xbe   : > { %v1347_v41 = vmax.f32 %v1170_v39, 0.0  ;;  %1122 = vmatmul.bf16.gmra.mxu2 %v1680_v37 }
  0xbf   : > { %1211 = vmatmul.bf16.gmra.mxu3 %v1684_v38 }
  0xc0   : > { %v2011_v42 = vpack.c.bf16 %v1347_v41, %v1346_v40 }
  0xc1   : > { %v1083_v43 = vpop.f32.mrf.mxu2  ;;  %v907_v46 = vpop.f32.mrf.mxu0 }
  0xc2   : > { %v1172_v44 = vpop.f32.mrf.mxu3  ;;  %2012 = vst [vmem:[%s2375_s8] sm:$0xff] %v2011_v42   ;;  %v996_v47 = vpop.f32.mrf.mxu1  ;;  %v1084_v50 = vadd.f32 %v1083_v43, %v995_v45  ;;  %v1719_v42 = vld [vmem:[%s2271_s21 + $0x180] sm:$0xf]  ;;  %v1994_v43 = vld [vmem:[%s2271_s21 + $0x18c] sm:$0xf0]  ;;  %v1992_v45 = vld [vmem:[%s2271_s21 + $0x184] sm:$0xf] }
  0xc3   : > { %v997_v57 = vadd.f32 %v996_v47, %v907_v46  ;;  %v1721_v46 = vld [vmem:[%s2271_s21 + $0x190] sm:$0xf0]  ;;  %v1727_v47 = vld [vmem:[%s2271_s21 + $0x188] sm:$0xf]  ;;  %v1720_v54 = vor.u32 %v1994_v43, %v1719_v42  ;;  %v2003_v42 = vld [vmem:[%s2271_s21 + $0x1d4] sm:$0xf0] }
  0xc4   : > { %v1173_v62 = vadd.f32 %v1172_v44, %v1084_v50  ;;  %v1729_v50 = vld [vmem:[%s2271_s21 + $0x198] sm:$0xf0]  ;;  %v1724_v55 = vor.u32 %v1992_v45, %v1721_v46  ;;  %v2001_v43 = vld [vmem:[%s2271_s21 + $0x1cc] sm:$0xf] }
  0xc6   : > { %v1348_v5 = vmax.f32 %v1173_v62, 0.0 }
  0xc9   : > { %v1085_v58 = vpop.f32.mrf.mxu2  ;;  %v910_v0 = vpop.f32.mrf.mxu0 }
  0xca   : > { %v1174_v59 = vpop.f32.mrf.mxu3  ;;  %v1086_v63 = vadd.f32 %v1085_v58, %v997_v57  ;;  %v999_v1 = vpop.f32.mrf.mxu1 }
  0xcb   : > { %v1000_v10 = vadd.f32 %v999_v1, %v910_v0 }
  0xcc   : > { %v1175_v4 = vadd.f32 %v1174_v59, %v1086_v63  ;;  %949 = vmatmul.bf16.gmra.mxu0 %v1688_v60  ;;  %v1728_v60 = vor.u32 %v1995_v48, %v1727_v47 }
  0xcd   : > { %1038 = vmatmul.bf16.gmra.mxu1 %v1692_v61  ;;  %v1732_v61 = vor.u32 %v1993_v49, %v1729_v50 }
  0xce   : > { %v1349_v6 = vmax.f32 %v1175_v4, 0.0  ;;  %1127 = vmatmul.bf16.gmra.mxu2 %v1696_v2 }
  0xcf   : > { %1216 = vmatmul.bf16.gmra.mxu3 %v1700_v3 }
  0xd0   : > { %v2016_v7 = vpack.c.bf16 %v1349_v6, %v1348_v5 }
  0xd1   : > { %v1088_v8 = vpop.f32.mrf.mxu2  ;;  %v912_v11 = vpop.f32.mrf.mxu0 }
  0xd2   : > { %v1177_v9 = vpop.f32.mrf.mxu3  ;;  %2088 = vst [vmem:[%s2375_s8 + $0x8] sm:$0xff] %v2016_v7   ;;  %v1001_v12 = vpop.f32.mrf.mxu1  ;;  %v1089_v15 = vadd.f32 %v1088_v8, %v1000_v10  ;;  %v1735_v7 = vld [vmem:[%s2271_s21 + $0x1a0] sm:$0xf]  ;;  %v1998_v8 = vld [vmem:[%s2271_s21 + $0x1ac] sm:$0xf0] }
  0xd3   : > { %v1002_v22 = vadd.f32 %v1001_v12, %v912_v11  ;;  %v1996_v10 = vld [vmem:[%s2271_s21 + $0x1a4] sm:$0xf]  ;;  %v1737_v11 = vld [vmem:[%s2271_s21 + $0x1b0] sm:$0xf0]  ;;  %v1743_v12 = vld [vmem:[%s2271_s21 + $0x1a8] sm:$0xf]  ;;  %v1736_v19 = vor.u32 %v1998_v8, %v1735_v7 }
  0xd4   : > { %v1178_v27 = vadd.f32 %v1177_v9, %v1089_v15  ;;  %v1745_v15 = vld [vmem:[%s2271_s21 + $0x1b8] sm:$0xf0]  ;;  %v1740_v20 = vor.u32 %v1996_v10, %v1737_v11  ;;  %v2007_v7 = vld [vmem:[%s2271_s21 + $0x1f4] sm:$0xf0]  ;;  %v2005_v8 = vld [vmem:[%s2271_s21 + $0x1ec] sm:$0xf] }
  0xd6   : > { %v1350_v34 = vmax.f32 %v1178_v27, 0.0 }
  0xd9   : > { %v1090_v23 = vpop.f32.mrf.mxu2  ;;  %v915_v29 = vpop.f32.mrf.mxu0 }
  0xda   : > { %v1179_v24 = vpop.f32.mrf.mxu3  ;;  %v1091_v28 = vadd.f32 %v1090_v23, %v1002_v22  ;;  %v1004_v30 = vpop.f32.mrf.mxu1 }
  0xdb   : > { %v1005_v39 = vadd.f32 %v1004_v30, %v915_v29 }
  0xdc   : > { %v1180_v33 = vadd.f32 %v1179_v24, %v1091_v28  ;;  %954 = vmatmul.bf16.gmra.mxu0 %v1704_v25  ;;  %v1744_v25 = vor.u32 %v1999_v13, %v1743_v12 }
  0xdd   : > { %1043 = vmatmul.bf16.gmra.mxu1 %v1708_v26  ;;  %v1748_v26 = vor.u32 %v1997_v14, %v1745_v15 }
  0xde   : > { %v1351_v35 = vmax.f32 %v1180_v33, 0.0  ;;  %1132 = vmatmul.bf16.gmra.mxu2 %v1712_v31 }
  0xdf   : > { %1221 = vmatmul.bf16.gmra.mxu3 %v1716_v32 }
  0xe0   : > { %v2021_v36 = vpack.c.bf16 %v1351_v35, %v1350_v34 }
  0xe1   : > { %v1093_v37 = vpop.f32.mrf.mxu2  ;;  %v917_v40 = vpop.f32.mrf.mxu0 }
  0xe2   : > { %v1182_v38 = vpop.f32.mrf.mxu3  ;;  %2089 = vst [vmem:[%s2375_s8 + $0x10] sm:$0xff] %v2021_v36   ;;  %v1006_v41 = vpop.f32.mrf.mxu1  ;;  %v1094_v44 = vadd.f32 %v1093_v37, %v1005_v39  ;;  %v1751_v36 = vld [vmem:[%s2271_s21 + $0x1c0] sm:$0xf]  ;;  %v2002_v37 = vld [vmem:[%s2271_s21 + $0x1cc] sm:$0xf0] }
  0xe3   : > { %v1007_v51 = vadd.f32 %v1006_v41, %v917_v40  ;;  %v2000_v39 = vld [vmem:[%s2271_s21 + $0x1c4] sm:$0xf]  ;;  %v1753_v40 = vld [vmem:[%s2271_s21 + $0x1d0] sm:$0xf0]  ;;  %v1759_v41 = vld [vmem:[%s2271_s21 + $0x1c8] sm:$0xf]  ;;  %v1752_v48 = vor.u32 %v2002_v37, %v1751_v36 }
  0xe4   : > { %v1183_v56 = vadd.f32 %v1182_v38, %v1094_v44  ;;  %v1761_v44 = vld [vmem:[%s2271_s21 + $0x1d8] sm:$0xf0]  ;;  %v1756_v49 = vor.u32 %v2000_v39, %v1753_v40 }
  0xe6   : > { %v1352_v63 = vmax.f32 %v1183_v56, 0.0 }
  0xe9   : > { %v1095_v52 = vpop.f32.mrf.mxu2  ;;  %v920_v58 = vpop.f32.mrf.mxu0 }
  0xea   : > { %v1184_v53 = vpop.f32.mrf.mxu3  ;;  %v1096_v57 = vadd.f32 %v1095_v52, %v1007_v51  ;;  %v1009_v59 = vpop.f32.mrf.mxu1 }
  0xeb   : > { %v1010_v4 = vadd.f32 %v1009_v59, %v920_v58 }
  0xec   : > { %v1185_v62 = vadd.f32 %v1184_v53, %v1096_v57  ;;  %959 = vmatmul.bf16.gmra.mxu0 %v1720_v54  ;;  %v1760_v54 = vor.u32 %v2003_v42, %v1759_v41 }
  0xed   : > { %1048 = vmatmul.bf16.gmra.mxu1 %v1724_v55  ;;  %v1764_v55 = vor.u32 %v2001_v43, %v1761_v44 }
  0xee   : > { %v1353_v0 = vmax.f32 %v1185_v62, 0.0  ;;  %1137 = vmatmul.bf16.gmra.mxu2 %v1728_v60 }
  0xef   : > { %1226 = vmatmul.bf16.gmra.mxu3 %v1732_v61 }
  0xf0   : > { %v2026_v1 = vpack.c.bf16 %v1353_v0, %v1352_v63 }
  0xf1   : > { %v1098_v2 = vpop.f32.mrf.mxu2  ;;  %v922_v5 = vpop.f32.mrf.mxu0 }
  0xf2   : > { %v1187_v3 = vpop.f32.mrf.mxu3  ;;  %2090 = vst [vmem:[%s2375_s8 + $0x18] sm:$0xff] %v2026_v1   ;;  %v1011_v6 = vpop.f32.mrf.mxu1  ;;  %v1099_v9 = vadd.f32 %v1098_v2, %v1010_v4  ;;  %v1767_v1 = vld [vmem:[%s2271_s21 + $0x1e0] sm:$0xf]  ;;  %v2006_v2 = vld [vmem:[%s2271_s21 + $0x1ec] sm:$0xf0] }
  0xf3   : > { %v1012_v16 = vadd.f32 %v1011_v6, %v922_v5  ;;  %v2004_v4 = vld [vmem:[%s2271_s21 + $0x1e4] sm:$0xf]  ;;  %v1769_v5 = vld [vmem:[%s2271_s21 + $0x1f0] sm:$0xf0]  ;;  %v1775_v6 = vld [vmem:[%s2271_s21 + $0x1e8] sm:$0xf]  ;;  %v1768_v13 = vor.u32 %v2006_v2, %v1767_v1 }
  0xf4   : > { %v1188_v21 = vadd.f32 %v1187_v3, %v1099_v9  ;;  %v1777_v9 = vld [vmem:[%s2271_s21 + $0x1f8] sm:$0xf0]  ;;  %v1772_v14 = vor.u32 %v2004_v4, %v1769_v5 }
  0xf6   : > { %v1354_v28 = vmax.f32 %v1188_v21, 0.0 }
  0xf9   : > { %v1100_v17 = vpop.f32.mrf.mxu2  ;;  %v925_v23 = vpop.f32.mrf.mxu0 }
  0xfa   : > { %v1189_v18 = vpop.f32.mrf.mxu3  ;;  %v1101_v22 = vadd.f32 %v1100_v17, %v1012_v16  ;;  %v1014_v24 = vpop.f32.mrf.mxu1 }
  0xfb   : > { %v1015_v33 = vadd.f32 %v1014_v24, %v925_v23 }
  0xfc   : > { %v1190_v27 = vadd.f32 %v1189_v18, %v1101_v22  ;;  %964 = vmatmul.bf16.gmra.mxu0 %v1736_v19  ;;  %v1776_v19 = vor.u32 %v2007_v7, %v1775_v6 }
  0xfd   : > { %1053 = vmatmul.bf16.gmra.mxu1 %v1740_v20  ;;  %v1780_v20 = vor.u32 %v2005_v8, %v1777_v9 }
  0xfe   : > { %v1355_v29 = vmax.f32 %v1190_v27, 0.0  ;;  %1142 = vmatmul.bf16.gmra.mxu2 %v1744_v25 }
  0xff   : > { %1231 = vmatmul.bf16.gmra.mxu3 %v1748_v26 }
 0x100   : > { %v2031_v30 = vpack.c.bf16 %v1355_v29, %v1354_v28 }
 0x101   : > { %v1103_v31 = vpop.f32.mrf.mxu2  ;;  %v927_v34 = vpop.f32.mrf.mxu0 }
 0x102   : > { %v1192_v32 = vpop.f32.mrf.mxu3  ;;  %2091 = vst [vmem:[%s2375_s8 + $0x20] sm:$0xff] %v2031_v30   ;;  %v1016_v35 = vpop.f32.mrf.mxu1  ;;  %v1104_v38 = vadd.f32 %v1103_v31, %v1015_v33 }
 0x103   : > { %v1017_v45 = vadd.f32 %v1016_v35, %v927_v34 }
 0x104   : > { %v1193_v50 = vadd.f32 %v1192_v32, %v1104_v38 }
 0x106   : > { %v1356_v57 = vmax.f32 %v1193_v50, 0.0 }
 0x109   : > { %v1105_v46 = vpop.f32.mrf.mxu2  ;;  %v930_v52 = vpop.f32.mrf.mxu0 }
 0x10a   : > { %v1194_v47 = vpop.f32.mrf.mxu3  ;;  %v1106_v51 = vadd.f32 %v1105_v46, %v1017_v45  ;;  %v1019_v53 = vpop.f32.mrf.mxu1 }
 0x10b   : > { %v1020_v62 = vadd.f32 %v1019_v53, %v930_v52 }
 0x10c   : > { %v1195_v56 = vadd.f32 %v1194_v47, %v1106_v51  ;;  %969 = vmatmul.bf16.gmra.mxu0 %v1752_v48 }
 0x10d   : > { %1058 = vmatmul.bf16.gmra.mxu1 %v1756_v49 }
 0x10e   : > { %v1357_v58 = vmax.f32 %v1195_v56, 0.0  ;;  %1147 = vmatmul.bf16.gmra.mxu2 %v1760_v54 }
 0x10f   : > { %1236 = vmatmul.bf16.gmra.mxu3 %v1764_v55 }
 0x110   : > { %v2036_v59 = vpack.c.bf16 %v1357_v58, %v1356_v57 }
 0x111   : > { %v1108_v60 = vpop.f32.mrf.mxu2  ;;  %v932_v63 = vpop.f32.mrf.mxu0 }
 0x112   : > { %v1197_v61 = vpop.f32.mrf.mxu3  ;;  %2092 = vst [vmem:[%s2375_s8 + $0x28] sm:$0xff] %v2036_v59   ;;  %v1021_v0 = vpop.f32.mrf.mxu1  ;;  %v1109_v3 = vadd.f32 %v1108_v60, %v1020_v62 }
 0x113   : > { %v1022_v10 = vadd.f32 %v1021_v0, %v932_v63 }
 0x114   : > { %v1198_v15 = vadd.f32 %v1197_v61, %v1109_v3 }
 0x116   : > { %v1358_v22 = vmax.f32 %v1198_v15, 0.0 }
 0x119   : > { %v1110_v11 = vpop.f32.mrf.mxu2  ;;  %v935_v17 = vpop.f32.mrf.mxu0 }
 0x11a   : > { %v1199_v12 = vpop.f32.mrf.mxu3  ;;  %v1111_v16 = vadd.f32 %v1110_v11, %v1022_v10  ;;  %v1024_v18 = vpop.f32.mrf.mxu1 }
 0x11b   : > { %v1025_v27 = vadd.f32 %v1024_v18, %v935_v17 }
 0x11c   : > { %v1200_v21 = vadd.f32 %v1199_v12, %v1111_v16  ;;  %974 = vmatmul.bf16.gmra.mxu0 %v1768_v13 }
 0x11d   : > { %1063 = vmatmul.bf16.gmra.mxu1 %v1772_v14 }
 0x11e   : > { %v1359_v23 = vmax.f32 %v1200_v21, 0.0  ;;  %1152 = vmatmul.bf16.gmra.mxu2 %v1776_v19 }
 0x11f   : > { %1241 = vmatmul.bf16.gmra.mxu3 %v1780_v20 }
 0x120   : > { %v2041_v24 = vpack.c.bf16 %v1359_v23, %v1358_v22 }
 0x121   : > { %v1113_v25 = vpop.f32.mrf.mxu2  ;;  %v937_v28 = vpop.f32.mrf.mxu0 }
 0x122   : > { %v1202_v26 = vpop.f32.mrf.mxu3  ;;  %2093 = vst [vmem:[%s2375_s8 + $0x30] sm:$0xff] %v2041_v24   ;;  %v1026_v29 = vpop.f32.mrf.mxu1  ;;  %v1114_v30 = vadd.f32 %v1113_v25, %v1025_v27 }
 0x123   : > { %v1027_v31 = vadd.f32 %v1026_v29, %v937_v28 }
 0x124   : > { %v1203_v34 = vadd.f32 %v1202_v26, %v1114_v30 }
 0x126   : > { %v1360_v39 = vmax.f32 %v1203_v34, 0.0 }
 0x129   : > { %v1115_v32 = vpop.f32.mrf.mxu2  ;;  %v940_v36 = vpop.f32.mrf.mxu0 }
 0x12a   : > { %v1204_v33 = vpop.f32.mrf.mxu3  ;;  %v1116_v35 = vadd.f32 %v1115_v32, %v1027_v31  ;;  %v1029_v37 = vpop.f32.mrf.mxu1 }
 0x12b   : > { %v1030_v44 = vadd.f32 %v1029_v37, %v940_v36 }
 0x12c   : > { %v1205_v38 = vadd.f32 %v1204_v33, %v1116_v35 }
 0x12e   : > { %v1361_v40 = vmax.f32 %v1205_v38, 0.0 }
 0x130   : > { %v2046_v41 = vpack.c.bf16 %v1361_v40, %v1360_v39 }
 0x131   : > { %v1118_v42 = vpop.f32.mrf.mxu2  ;;  %v942_v45 = vpop.f32.mrf.mxu0 }
 0x132   : > { %v1207_v43 = vpop.f32.mrf.mxu3  ;;  %2094 = vst [vmem:[%s2375_s8 + $0x38] sm:$0xff] %v2046_v41   ;;  %v1031_v46 = vpop.f32.mrf.mxu1  ;;  %v1119_v47 = vadd.f32 %v1118_v42, %v1030_v44 }
 0x133   : > { %v1032_v48 = vadd.f32 %v1031_v46, %v942_v45 }
 0x134   : > { %v1208_v51 = vadd.f32 %v1207_v43, %v1119_v47 }
 0x136   : > { %v1362_v56 = vmax.f32 %v1208_v51, 0.0 }
 0x139   : > { %v1120_v49 = vpop.f32.mrf.mxu2  ;;  %v945_v53 = vpop.f32.mrf.mxu0 }
 0x13a   : > { %v1209_v50 = vpop.f32.mrf.mxu3  ;;  %v1121_v52 = vadd.f32 %v1120_v49, %v1032_v48  ;;  %v1034_v54 = vpop.f32.mrf.mxu1 }
 0x13b   : > { %v1035_v61 = vadd.f32 %v1034_v54, %v945_v53 }
 0x13c   : > { %v1210_v55 = vadd.f32 %v1209_v50, %v1121_v52 }
 0x13e   : > { %v1363_v57 = vmax.f32 %v1210_v55, 0.0 }
 0x140   : > { %v2051_v58 = vpack.c.bf16 %v1363_v57, %v1362_v56 }
 0x141   : > { %v1123_v59 = vpop.f32.mrf.mxu2  ;;  %v947_v62 = vpop.f32.mrf.mxu0 }
 0x142   : > { %v1212_v60 = vpop.f32.mrf.mxu3  ;;  %2095 = vst [vmem:[%s2375_s8 + $0x40] sm:$0xff] %v2051_v58   ;;  %v1036_v63 = vpop.f32.mrf.mxu1  ;;  %v1124_v0 = vadd.f32 %v1123_v59, %v1035_v61 }
 0x143   : > { %v1037_v1 = vadd.f32 %v1036_v63, %v947_v62 }
 0x144   : > { %v1213_v4 = vadd.f32 %v1212_v60, %v1124_v0 }
 0x146   : > { %v1364_v9 = vmax.f32 %v1213_v4, 0.0 }
 0x149   : > { %v1125_v2 = vpop.f32.mrf.mxu2  ;;  %v950_v6 = vpop.f32.mrf.mxu0 }
 0x14a   : > { %v1214_v3 = vpop.f32.mrf.mxu3  ;;  %v1126_v5 = vadd.f32 %v1125_v2, %v1037_v1  ;;  %v1039_v7 = vpop.f32.mrf.mxu1 }
 0x14b   : > { %v1040_v14 = vadd.f32 %v1039_v7, %v950_v6 }
 0x14c   : > { %v1215_v8 = vadd.f32 %v1214_v3, %v1126_v5 }
 0x14e   : > { %v1365_v10 = vmax.f32 %v1215_v8, 0.0 }
 0x150   : > { %v2056_v11 = vpack.c.bf16 %v1365_v10, %v1364_v9 }
 0x151   : > { %v1128_v12 = vpop.f32.mrf.mxu2  ;;  %v952_v15 = vpop.f32.mrf.mxu0 }
 0x152   : > { %v1217_v13 = vpop.f32.mrf.mxu3  ;;  %2096 = vst [vmem:[%s2375_s8 + $0x48] sm:$0xff] %v2056_v11   ;;  %v1041_v16 = vpop.f32.mrf.mxu1  ;;  %v1129_v17 = vadd.f32 %v1128_v12, %v1040_v14 }
 0x153   : > { %v1042_v18 = vadd.f32 %v1041_v16, %v952_v15 }
 0x154   : > { %v1218_v21 = vadd.f32 %v1217_v13, %v1129_v17 }
 0x156   : > { %v1366_v26 = vmax.f32 %v1218_v21, 0.0 }
 0x159   : > { %v1130_v19 = vpop.f32.mrf.mxu2  ;;  %v955_v23 = vpop.f32.mrf.mxu0 }
 0x15a   : > { %v1219_v20 = vpop.f32.mrf.mxu3  ;;  %v1131_v22 = vadd.f32 %v1130_v19, %v1042_v18  ;;  %v1044_v24 = vpop.f32.mrf.mxu1 }
 0x15b   : > { %v1045_v31 = vadd.f32 %v1044_v24, %v955_v23 }
 0x15c   : > { %v1220_v25 = vadd.f32 %v1219_v20, %v1131_v22 }
 0x15e   : > { %v1367_v27 = vmax.f32 %v1220_v25, 0.0 }
 0x160   : > { %v2061_v28 = vpack.c.bf16 %v1367_v27, %v1366_v26 }
 0x161   : > { %v1133_v29 = vpop.f32.mrf.mxu2  ;;  %v957_v32 = vpop.f32.mrf.mxu0 }
 0x162   : > { %v1222_v30 = vpop.f32.mrf.mxu3  ;;  %2097 = vst [vmem:[%s2375_s8 + $0x50] sm:$0xff] %v2061_v28   ;;  %v1046_v33 = vpop.f32.mrf.mxu1  ;;  %v1134_v34 = vadd.f32 %v1133_v29, %v1045_v31 }
 0x163   : > { %v1047_v35 = vadd.f32 %v1046_v33, %v957_v32 }
 0x164   : > { %v1223_v38 = vadd.f32 %v1222_v30, %v1134_v34 }
 0x166   : > { %v1368_v43 = vmax.f32 %v1223_v38, 0.0 }
 0x169   : > { %v1135_v36 = vpop.f32.mrf.mxu2  ;;  %v960_v40 = vpop.f32.mrf.mxu0 }
 0x16a   : > { %v1224_v37 = vpop.f32.mrf.mxu3  ;;  %v1136_v39 = vadd.f32 %v1135_v36, %v1047_v35  ;;  %v1049_v41 = vpop.f32.mrf.mxu1 }
 0x16b   : > { %v1050_v48 = vadd.f32 %v1049_v41, %v960_v40 }
 0x16c   : > { %v1225_v42 = vadd.f32 %v1224_v37, %v1136_v39 }
 0x16e   : > { %v1369_v44 = vmax.f32 %v1225_v42, 0.0 }
 0x170   : > { %v2066_v45 = vpack.c.bf16 %v1369_v44, %v1368_v43 }
 0x171   : > { %v1138_v46 = vpop.f32.mrf.mxu2  ;;  %v962_v49 = vpop.f32.mrf.mxu0 }
 0x172   : > { %v1227_v47 = vpop.f32.mrf.mxu3  ;;  %2098 = vst [vmem:[%s2375_s8 + $0x58] sm:$0xff] %v2066_v45   ;;  %v1051_v50 = vpop.f32.mrf.mxu1  ;;  %v1139_v51 = vadd.f32 %v1138_v46, %v1050_v48 }
 0x173   : > { %v1052_v52 = vadd.f32 %v1051_v50, %v962_v49 }
 0x174   : > { %v1228_v55 = vadd.f32 %v1227_v47, %v1139_v51 }
 0x176   : > { %v1370_v60 = vmax.f32 %v1228_v55, 0.0 }
 0x179   : > { %v1140_v53 = vpop.f32.mrf.mxu2  ;;  %v965_v57 = vpop.f32.mrf.mxu0 }
 0x17a   : > { %v1229_v54 = vpop.f32.mrf.mxu3  ;;  %v1141_v56 = vadd.f32 %v1140_v53, %v1052_v52  ;;  %v1054_v58 = vpop.f32.mrf.mxu1 }
 0x17b   : > { %v1055_v1 = vadd.f32 %v1054_v58, %v965_v57 }
 0x17c   : > { %v1230_v59 = vadd.f32 %v1229_v54, %v1141_v56 }
 0x17e   : > { %v1371_v61 = vmax.f32 %v1230_v59, 0.0 }
 0x180   : > { %v2071_v62 = vpack.c.bf16 %v1371_v61, %v1370_v60 }
 0x181   : > { %v1143_v63 = vpop.f32.mrf.mxu2  ;;  %v967_v2 = vpop.f32.mrf.mxu0 }
 0x182   : > { %v1232_v0 = vpop.f32.mrf.mxu3  ;;  %2099 = vst [vmem:[%s2375_s8 + $0x60] sm:$0xff] %v2071_v62   ;;  %v1056_v3 = vpop.f32.mrf.mxu1  ;;  %v1144_v4 = vadd.f32 %v1143_v63, %v1055_v1 }
 0x183   : > { %v1057_v5 = vadd.f32 %v1056_v3, %v967_v2 }
 0x184   : > { %v1233_v8 = vadd.f32 %v1232_v0, %v1144_v4 }
 0x186   : > { %v1372_v13 = vmax.f32 %v1233_v8, 0.0 }
 0x189   : > { %v1145_v6 = vpop.f32.mrf.mxu2  ;;  %v970_v10 = vpop.f32.mrf.mxu0 }
 0x18a   : > { %v1234_v7 = vpop.f32.mrf.mxu3  ;;  %v1146_v9 = vadd.f32 %v1145_v6, %v1057_v5  ;;  %v1059_v11 = vpop.f32.mrf.mxu1 }
 0x18b   : > { %v1060_v18 = vadd.f32 %v1059_v11, %v970_v10 }
 0x18c   : > { %v1235_v12 = vadd.f32 %v1234_v7, %v1146_v9 }
 0x18e   : > { %v1373_v14 = vmax.f32 %v1235_v12, 0.0 }
 0x190   : > { %v2076_v15 = vpack.c.bf16 %v1373_v14, %v1372_v13 }
 0x191   : > { %v1148_v16 = vpop.f32.mrf.mxu2  ;;  %v972_v19 = vpop.f32.mrf.mxu0 }
 0x192   : > { %v1237_v17 = vpop.f32.mrf.mxu3  ;;  %2100 = vst [vmem:[%s2375_s8 + $0x68] sm:$0xff] %v2076_v15   ;;  %v1061_v20 = vpop.f32.mrf.mxu1  ;;  %v1149_v21 = vadd.f32 %v1148_v16, %v1060_v18 }
 0x193   : > { %v1062_v22 = vadd.f32 %v1061_v20, %v972_v19 }
 0x194   : > { %v1238_v25 = vadd.f32 %v1237_v17, %v1149_v21 }
 0x196   : > { %v1374_v30 = vmax.f32 %v1238_v25, 0.0 }
 0x199   : > { %v1150_v23 = vpop.f32.mrf.mxu2  ;;  %v975_v27 = vpop.f32.mrf.mxu0 }
 0x19a   : > { %v1239_v24 = vpop.f32.mrf.mxu3  ;;  %v1151_v26 = vadd.f32 %v1150_v23, %v1062_v22  ;;  %v1064_v28 = vpop.f32.mrf.mxu1 }
 0x19b   : > { %v1065_v35 = vadd.f32 %v1064_v28, %v975_v27 }
 0x19c   : > { %v1240_v29 = vadd.f32 %v1239_v24, %v1151_v26 }
 0x19e   : > { %v1375_v31 = vmax.f32 %v1240_v29, 0.0 }
 0x1a0   : > { %v2081_v32 = vpack.c.bf16 %v1375_v31, %v1374_v30 }
 0x1a1   : > { %v1153_v33 = vpop.f32.mrf.mxu2  ;;  %v977_v36 = vpop.f32.mrf.mxu0 }
 0x1a2   : > { %v1242_v34 = vpop.f32.mrf.mxu3  ;;  %2101 = vst [vmem:[%s2375_s8 + $0x70] sm:$0xff] %v2081_v32   ;;  %v1066_v37 = vpop.f32.mrf.mxu1  ;;  %v1154_v38 = vadd.f32 %v1153_v33, %v1065_v35 }
 0x1a3   : > { %v1067_v39 = vadd.f32 %v1066_v37, %v977_v36 }
 0x1a4   : > { %v1243_v41 = vadd.f32 %v1242_v34, %v1154_v38 }
 0x1a6   : > { %v1376_v45 = vmax.f32 %v1243_v41, 0.0 }
 0x1a9   : > { %v1155_v40 = vpop.f32.mrf.mxu2 }
 0x1aa   : > { %v1156_v42 = vadd.f32 %v1155_v40, %v1067_v39  ;;  %v1244_v43 = vpop.f32.mrf.mxu3 }
 0x1ac   : > { %v1245_v44 = vadd.f32 %v1244_v43, %v1156_v42 }
 0x1ae   : > { %v1377_v46 = vmax.f32 %v1245_v44, 0.0 }
 0x1b0   : > { %v2086_v47 = vpack.c.bf16 %v1377_v46, %v1376_v45 }
 0x1b2   : > { %2102 = vst [vmem:[%s2375_s8 + $0x78] sm:$0xff] %v2086_v47  }
 0x1b3 PF: > { %s12_s11 = sadd.s32 1, %s2149_s11   ;;  %s2453_s9 = smov %s2145_s10 }
 0x1b4   : > { %p9_p5 = scmp.ge.s32.totalorder %s12_s11, 4   ;;  %s2454_s10 = smov %s2456_s12 }
 0x1b6   :  { %11 = sbr.rel (!%p9_p5) target bundleno = 2 (0x2), region = 67 }

// kernel: hypergcn_forward.7
= control target key start
LH: loop header
LB: loop body
LE: loop exit
PB: predicated region body
PF: predicated region fallthrough
CT: control target
= control target key end

     0   :  { %s2007_s9 = smov 0   ;;  %s2009_s10 = smov 0   ;;  %s2307_s0 = inlined_call_operand.vmem [shape: bf16[512,512], index: 0, kind: input, shape index: {}]   ;;  %s2308_s1 = inlined_call_operand.vmem [shape: bf16[512,128], index: 1, kind: input, shape index: {}]   ;;  %s2309_s2 = inlined_call_operand.vmem [shape: f32[512,128], index: 2, kind: output, shape index: {}]  }
   0x1   :  { %s2011_s11 = smov 0  }
   0x2 LB: > { %s24_s12 = sadd.s32 1, %s1986_s10  ;;  %p1455_p0 = scmp.ge.s32.totalorder %s1990_s11, 1  ;;  %s1990_s11 = sphi %s2011_s11, %s12_s11   ;;  %s1986_s10 = sphi %s2009_s10, %s2311_s10   ;;  %s1982_s9 = sphi %s2007_s9, %s2310_s9  }
   0x3   : > { %p26_p1 = scmp.ge.s32.totalorder %s24_s12, 2  ;;  %p133_p2 = scmp.lt.s32.totalorder %s1990_s11, 3 }
   0x5   : > { %s2313_s12 = smov (%p26_p1, %s24_s12), 0  ;;  %p134_p3 = pnand %p1455_p0, %p133_p2 }
   0x6   : > { %s1456_s13 = sshll.u32 (!%p134_p3), %s1982_s9, 5 }
   0x7   : > { %137 = sbr.rel (%p134_p3) target bundleno = 431 (0x1af), region = 28  ;;  %p162_p4 = scmp.lt.s32.totalorder (!%p134_p3), %s1456_s13, 63 }
   0xc   : > { %v1855_v0 = vld [vmem:[%s2308_s1 + $0x38] sm:$0xff]  ;;  %v1854_v4 = vld [vmem:[%s2308_s1 + $0x30] sm:$0xff]  ;;  %v1853_v8 = vld [vmem:[%s2308_s1 + $0x28] sm:$0xff]  ;;  %s2315_s13 = smov (!%p162_p4, %s1456_s13), 63 }
   0xd   : > { %v1863_v1 = vld [vmem:[%s2308_s1 + $0x78] sm:$0xff]  ;;  %891 = vmatpush.bf16.msra.mxu0 %v1855_v0  ;;  %v1862_v5 = vld [vmem:[%s2308_s1 + $0x70] sm:$0xff]  ;;  %v1861_v9 = vld [vmem:[%s2308_s1 + $0x68] sm:$0xff]  ;;  %s1847_s14 = sshll.u32 %s2315_s13, 4  ;;  %s1460_s5 = sshll.u32 %s2315_s13, 3 }
   0xe   : > { %v1871_v2 = vld [vmem:[%s2308_s1 + $0xb8] sm:$0xff]  ;;  %980 = vmatpush.bf16.msra.mxu1 %v1863_v1  ;;  %v1870_v6 = vld [vmem:[%s2308_s1 + $0xb0] sm:$0xff]  ;;  %v1869_v10 = vld [vmem:[%s2308_s1 + $0xa8] sm:$0xff]  ;;  %s2112_s21 = scalar_lea.vmem %s2307_s0, %s1847_s14  ;;  %s2208_s8 = scalar_lea.vmem %s2309_s2, %s1460_s5 }
   0xf   : > { %v1879_v3 = vld [vmem:[%s2308_s1 + $0xf8] sm:$0xff]  ;;  %1069 = vmatpush.bf16.msra.mxu2 %v1871_v2  ;;  %v1878_v7 = vld [vmem:[%s2308_s1 + $0xf0] sm:$0xff]  ;;  %v1877_v11 = vld [vmem:[%s2308_s1 + $0xe8] sm:$0xff] }
  0x10   : > { %1158 = vmatpush.bf16.msra.mxu3 %v1879_v3  ;;  %v1852_v12 = vld [vmem:[%s2308_s1 + $0x20] sm:$0xff]  ;;  %v1851_v16 = vld [vmem:[%s2308_s1 + $0x18] sm:$0xff]  ;;  %v1850_v20 = vld [vmem:[%s2308_s1 + $0x10] sm:$0xff] }
  0x11   : > { %892 = vmatpush.bf16.msra.mxu0 %v1854_v4  ;;  %v1860_v13 = vld [vmem:[%s2308_s1 + $0x60] sm:$0xff]  ;;  %v1859_v17 = vld [vmem:[%s2308_s1 + $0x58] sm:$0xff]  ;;  %v1858_v21 = vld [vmem:[%s2308_s1 + $0x50] sm:$0xff] }
  0x12   : > { %981 = vmatpush.bf16.msra.mxu1 %v1862_v5  ;;  %v1868_v14 = vld [vmem:[%s2308_s1 + $0xa0] sm:$0xff]  ;;  %v1867_v18 = vld [vmem:[%s2308_s1 + $0x98] sm:$0xff]  ;;  %v1866_v22 = vld [vmem:[%s2308_s1 + $0x90] sm:$0xff] }
  0x13   : > { %1070 = vmatpush.bf16.msra.mxu2 %v1870_v6  ;;  %v1876_v15 = vld [vmem:[%s2308_s1 + $0xe0] sm:$0xff]  ;;  %v1875_v19 = vld [vmem:[%s2308_s1 + $0xd8] sm:$0xff]  ;;  %v1874_v23 = vld [vmem:[%s2308_s1 + $0xd0] sm:$0xff] }
  0x14   : > { %1159 = vmatpush.bf16.msra.mxu3 %v1878_v7  ;;  %v1849_v24 = vld [vmem:[%s2308_s1 + $0x8] sm:$0xff]  ;;  %v1848_v28 = vld [vmem:[%s2308_s1] sm:$0xff]  ;;  %v1882_v33 = vld [vmem:[%s2112_s21 + $0xc] sm:$0xf0] }
  0x15   : > { %893 = vmatpush.bf16.msra.mxu0 %v1853_v8  ;;  %v1857_v25 = vld [vmem:[%s2308_s1 + $0x48] sm:$0xff]  ;;  %v1856_v29 = vld [vmem:[%s2308_s1 + $0x40] sm:$0xff]  ;;  %v1465_v35 = vld [vmem:[%s2112_s21 + $0x10] sm:$0xf0] }
  0x16   : > { %982 = vmatpush.bf16.msra.mxu1 %v1861_v9  ;;  %v1865_v26 = vld [vmem:[%s2308_s1 + $0x88] sm:$0xff]  ;;  %v1864_v30 = vld [vmem:[%s2308_s1 + $0x80] sm:$0xff]  ;;  %v1883_v37 = vld [vmem:[%s2112_s21 + $0x14] sm:$0xf0] }
  0x17   : > { %1071 = vmatpush.bf16.msra.mxu2 %v1869_v10  ;;  %v1873_v27 = vld [vmem:[%s2308_s1 + $0xc8] sm:$0xff]  ;;  %v1872_v31 = vld [vmem:[%s2308_s1 + $0xc0] sm:$0xff]  ;;  %v1473_v39 = vld [vmem:[%s2112_s21 + $0x18] sm:$0xf0] }
  0x18   : > { %1160 = vmatpush.bf16.msra.mxu3 %v1877_v11  ;;  %v1463_v32 = vld [vmem:[%s2112_s21] sm:$0xf]  ;;  %v1880_v34 = vld [vmem:[%s2112_s21 + $0x4] sm:$0xf]  ;;  %v1471_v36 = vld [vmem:[%s2112_s21 + $0x8] sm:$0xf] }
  0x19   : > { %894 = vmatpush.bf16.msra.mxu0 %v1852_v12  ;;  %v1881_v38 = vld [vmem:[%s2112_s21 + $0xc] sm:$0xf]  ;;  %v1464_v40 = vor.u32 %v1882_v33, %v1463_v32  ;;  %v1468_v41 = vor.u32 %v1880_v34, %v1465_v35  ;;  %v1472_v42 = vor.u32 %v1883_v37, %v1471_v36  ;;  %v1479_v44 = vld [vmem:[%s2112_s21 + $0x20] sm:$0xf]  ;;  %v1886_v45 = vld [vmem:[%s2112_s21 + $0x2c] sm:$0xf0] }
  0x1a   : > { %983 = vmatpush.bf16.msra.mxu1 %v1860_v13  ;;  %v1476_v43 = vor.u32 %v1881_v38, %v1473_v39  ;;  %v1884_v46 = vld [vmem:[%s2112_s21 + $0x24] sm:$0xf]  ;;  %v1481_v47 = vld [vmem:[%s2112_s21 + $0x30] sm:$0xf0]  ;;  %v1487_v48 = vld [vmem:[%s2112_s21 + $0x28] sm:$0xf]  ;;  %v1480_v52 = vor.u32 %v1886_v45, %v1479_v44 }
  0x1b   : > { %1072 = vmatpush.bf16.msra.mxu2 %v1868_v14  ;;  %v1887_v49 = vld [vmem:[%s2112_s21 + $0x34] sm:$0xf0]  ;;  %v1885_v50 = vld [vmem:[%s2112_s21 + $0x2c] sm:$0xf]  ;;  %v1489_v51 = vld [vmem:[%s2112_s21 + $0x38] sm:$0xf0]  ;;  %v1484_v53 = vor.u32 %v1884_v46, %v1481_v47 }
  0x1c   : > { %1161 = vmatpush.bf16.msra.mxu3 %v1876_v15  ;;  %v1488_v54 = vor.u32 %v1887_v49, %v1487_v48  ;;  %v1492_v55 = vor.u32 %v1885_v50, %v1489_v51  ;;  %v1495_v56 = vld [vmem:[%s2112_s21 + $0x40] sm:$0xf]  ;;  %v1890_v57 = vld [vmem:[%s2112_s21 + $0x4c] sm:$0xf0]  ;;  %v1888_v58 = vld [vmem:[%s2112_s21 + $0x44] sm:$0xf] }
  0x1d   : > { %895 = vmatpush.bf16.msra.mxu0 %v1851_v16  ;;  %v1497_v59 = vld [vmem:[%s2112_s21 + $0x50] sm:$0xf0]  ;;  %v1503_v60 = vld [vmem:[%s2112_s21 + $0x48] sm:$0xf]  ;;  %v1891_v61 = vld [vmem:[%s2112_s21 + $0x54] sm:$0xf0]  ;;  %v1496_v0 = vor.u32 %v1890_v57, %v1495_v56 }
  0x1e   : > { %984 = vmatpush.bf16.msra.mxu1 %v1859_v17  ;;  %v1889_v62 = vld [vmem:[%s2112_s21 + $0x4c] sm:$0xf]  ;;  %v1505_v63 = vld [vmem:[%s2112_s21 + $0x58] sm:$0xf0]  ;;  %v1500_v1 = vor.u32 %v1888_v58, %v1497_v59  ;;  %v1504_v2 = vor.u32 %v1891_v61, %v1503_v60  ;;  %v1511_v4 = vld [vmem:[%s2112_s21 + $0x60] sm:$0xf] }
  0x1f   : > { %1073 = vmatpush.bf16.msra.mxu2 %v1867_v18  ;;  %v1508_v3 = vor.u32 %v1889_v62, %v1505_v63  ;;  %v1894_v5 = vld [vmem:[%s2112_s21 + $0x6c] sm:$0xf0]  ;;  %v1892_v6 = vld [vmem:[%s2112_s21 + $0x64] sm:$0xf]  ;;  %v1513_v7 = vld [vmem:[%s2112_s21 + $0x70] sm:$0xf0] }
  0x20   : > { %1162 = vmatpush.bf16.msra.mxu3 %v1875_v19  ;;  %v1519_v8 = vld [vmem:[%s2112_s21 + $0x68] sm:$0xf]  ;;  %v1895_v9 = vld [vmem:[%s2112_s21 + $0x74] sm:$0xf0]  ;;  %v1893_v10 = vld [vmem:[%s2112_s21 + $0x6c] sm:$0xf]  ;;  %v1512_v12 = vor.u32 %v1894_v5, %v1511_v4  ;;  %v1516_v13 = vor.u32 %v1892_v6, %v1513_v7 }
  0x21   : > { %896 = vmatpush.bf16.msra.mxu0 %v1850_v20  ;;  %v1521_v11 = vld [vmem:[%s2112_s21 + $0x78] sm:$0xf0]  ;;  %v1520_v14 = vor.u32 %v1895_v9, %v1519_v8  ;;  %v1527_v16 = vld [vmem:[%s2112_s21 + $0x80] sm:$0xf]  ;;  %v1898_v17 = vld [vmem:[%s2112_s21 + $0x8c] sm:$0xf0] }
  0x22   : > { %985 = vmatpush.bf16.msra.mxu1 %v1858_v21  ;;  %v1524_v15 = vor.u32 %v1893_v10, %v1521_v11  ;;  %v1896_v18 = vld [vmem:[%s2112_s21 + $0x84] sm:$0xf]  ;;  %v1529_v19 = vld [vmem:[%s2112_s21 + $0x90] sm:$0xf0]  ;;  %v1535_v20 = vld [vmem:[%s2112_s21 + $0x88] sm:$0xf] }
  0x23   : > { %1074 = vmatpush.bf16.msra.mxu2 %v1866_v22  ;;  %v1899_v21 = vld [vmem:[%s2112_s21 + $0x94] sm:$0xf0]  ;;  %v1897_v22 = vld [vmem:[%s2112_s21 + $0x8c] sm:$0xf]  ;;  %v1551_v32 = vld [vmem:[%s2112_s21 + $0xa8] sm:$0xf] }
  0x24   : > { %1163 = vmatpush.bf16.msra.mxu3 %v1874_v23  ;;  %v1537_v23 = vld [vmem:[%s2112_s21 + $0x98] sm:$0xf0]  ;;  %v1903_v33 = vld [vmem:[%s2112_s21 + $0xb4] sm:$0xf0]  ;;  %v1901_v34 = vld [vmem:[%s2112_s21 + $0xac] sm:$0xf] }
  0x25   : > { %897 = vmatpush.bf16.msra.mxu0 %v1849_v24  ;;  %v1528_v24 = vor.u32 %v1898_v17, %v1527_v16  ;;  %v1553_v35 = vld [vmem:[%s2112_s21 + $0xb8] sm:$0xf0]  ;;  %v1552_v38 = vor.u32 %v1903_v33, %v1551_v32  ;;  %v1567_v44 = vld [vmem:[%s2112_s21 + $0xc8] sm:$0xf]  ;;  %v1907_v45 = vld [vmem:[%s2112_s21 + $0xd4] sm:$0xf0] }
  0x26   : > { %986 = vmatpush.bf16.msra.mxu1 %v1857_v25  ;;  %v1532_v25 = vor.u32 %v1896_v18, %v1529_v19  ;;  %v1556_v39 = vor.u32 %v1901_v34, %v1553_v35  ;;  %v1905_v46 = vld [vmem:[%s2112_s21 + $0xcc] sm:$0xf]  ;;  %v1569_v47 = vld [vmem:[%s2112_s21 + $0xd8] sm:$0xf0]  ;;  %v1568_v50 = vor.u32 %v1907_v45, %v1567_v44  ;;  %v1583_v56 = vld [vmem:[%s2112_s21 + $0xe8] sm:$0xf] }
  0x27   : > { %1075 = vmatpush.bf16.msra.mxu2 %v1865_v26  ;;  %v1536_v26 = vor.u32 %v1899_v21, %v1535_v20  ;;  %v1572_v51 = vor.u32 %v1905_v46, %v1569_v47  ;;  %v1911_v57 = vld [vmem:[%s2112_s21 + $0xf4] sm:$0xf0]  ;;  %v1909_v58 = vld [vmem:[%s2112_s21 + $0xec] sm:$0xf]  ;;  %v1585_v59 = vld [vmem:[%s2112_s21 + $0xf8] sm:$0xf0] }
  0x28   : > { %1164 = vmatpush.bf16.msra.mxu3 %v1873_v27  ;;  %v1540_v27 = vor.u32 %v1897_v22, %v1537_v23  ;;  %v1584_v62 = vor.u32 %v1911_v57, %v1583_v56  ;;  %v1588_v63 = vor.u32 %v1909_v58, %v1585_v59  ;;  %v1599_v4 = vld [vmem:[%s2112_s21 + $0x108] sm:$0xf]  ;;  %v1915_v5 = vld [vmem:[%s2112_s21 + $0x114] sm:$0xf0]  ;;  %v1913_v6 = vld [vmem:[%s2112_s21 + $0x10c] sm:$0xf] }
  0x29   : > { %898 = vmatpush.bf16.msra.mxu0 %v1848_v28  ;;  %v1543_v28 = vld [vmem:[%s2112_s21 + $0xa0] sm:$0xf]  ;;  %v1601_v7 = vld [vmem:[%s2112_s21 + $0x118] sm:$0xf0]  ;;  %v1918_v22 = vld [vmem:[%s2112_s21 + $0x12c] sm:$0xf0] }
  0x2a   : > { %987 = vmatpush.bf16.msra.mxu1 %v1856_v29  ;;  %v1902_v29 = vld [vmem:[%s2112_s21 + $0xac] sm:$0xf0]  ;;  %v1607_v21 = vld [vmem:[%s2112_s21 + $0x120] sm:$0xf]  ;;  %v1916_v23 = vld [vmem:[%s2112_s21 + $0x124] sm:$0xf] }
  0x2b   : > { %1076 = vmatpush.bf16.msra.mxu2 %v1864_v30  ;;  %v1900_v30 = vld [vmem:[%s2112_s21 + $0xa4] sm:$0xf]  ;;  %v1544_v36 = vor.u32 %v1902_v29, %v1543_v28  ;;  %v1617_v28 = vld [vmem:[%s2112_s21 + $0x138] sm:$0xf0]  ;;  %v1608_v32 = vor.u32 %v1918_v22, %v1607_v21  ;;  %v1623_v47 = vld [vmem:[%s2112_s21 + $0x140] sm:$0xf] }
  0x2c   : > { %1165 = vmatpush.bf16.msra.mxu3 %v1872_v31  ;;  %899 = vmatmul.bf16.vlgmr.msra.gmra.mxu0 %v1464_v40  ;;  %v1545_v31 = vld [vmem:[%s2112_s21 + $0xb0] sm:$0xf0]  ;;  %v1559_v40 = vld [vmem:[%s2112_s21 + $0xc0] sm:$0xf] }
  0x2d   : > { %988 = vmatmul.bf16.vlgmr.msra.gmra.mxu1 %v1468_v41  ;;  %v1548_v37 = vor.u32 %v1900_v30, %v1545_v31  ;;  %v1906_v41 = vld [vmem:[%s2112_s21 + $0xcc] sm:$0xf0] }
  0x2e   : > { %1077 = vmatmul.bf16.vlgmr.msra.gmra.mxu2 %v1472_v42  ;;  %v1904_v42 = vld [vmem:[%s2112_s21 + $0xc4] sm:$0xf]  ;;  %v1560_v48 = vor.u32 %v1906_v41, %v1559_v40 }
  0x2f   : > { %1166 = vmatmul.bf16.vlgmr.msra.gmra.mxu3 %v1476_v43  ;;  %v1561_v43 = vld [vmem:[%s2112_s21 + $0xd0] sm:$0xf0] }
  0x30   : > { %v1564_v49 = vor.u32 %v1904_v42, %v1561_v43 }
  0x3c   : > { %904 = vmatmul.bf16.gmra.mxu0 %v1480_v52  ;;  %v1575_v52 = vld [vmem:[%s2112_s21 + $0xe0] sm:$0xf] }
  0x3d   : > { %993 = vmatmul.bf16.gmra.mxu1 %v1484_v53  ;;  %v1910_v53 = vld [vmem:[%s2112_s21 + $0xec] sm:$0xf0] }
  0x3e   : > { %1082 = vmatmul.bf16.gmra.mxu2 %v1488_v54  ;;  %v1908_v54 = vld [vmem:[%s2112_s21 + $0xe4] sm:$0xf]  ;;  %v1576_v60 = vor.u32 %v1910_v53, %v1575_v52  ;;  %v1923_v52 = vld [vmem:[%s2112_s21 + $0x154] sm:$0xf0]  ;;  %v1921_v53 = vld [vmem:[%s2112_s21 + $0x14c] sm:$0xf] }
  0x3f   : > { %1171 = vmatmul.bf16.gmra.mxu3 %v1492_v55  ;;  %v1577_v55 = vld [vmem:[%s2112_s21 + $0xf0] sm:$0xf0] }
  0x40   : > { %v1580_v61 = vor.u32 %v1908_v54, %v1577_v55  ;;  %v1633_v54 = vld [vmem:[%s2112_s21 + $0x158] sm:$0xf0] }
  0x4c   : > { %909 = vmatmul.bf16.gmra.mxu0 %v1496_v0  ;;  %v1591_v0 = vld [vmem:[%s2112_s21 + $0x100] sm:$0xf] }
  0x4d   : > { %998 = vmatmul.bf16.gmra.mxu1 %v1500_v1  ;;  %v1914_v1 = vld [vmem:[%s2112_s21 + $0x10c] sm:$0xf0] }
  0x4e   : > { %1087 = vmatmul.bf16.gmra.mxu2 %v1504_v2  ;;  %v1912_v2 = vld [vmem:[%s2112_s21 + $0x104] sm:$0xf]  ;;  %v1592_v8 = vor.u32 %v1914_v1, %v1591_v0  ;;  %v1636_v0 = vor.u32 %v1921_v53, %v1633_v54 }
  0x4f   : > { %1176 = vmatmul.bf16.gmra.mxu3 %v1508_v3  ;;  %v1593_v3 = vld [vmem:[%s2112_s21 + $0x110] sm:$0xf0] }
  0x50   : > { %v1596_v9 = vor.u32 %v1912_v2, %v1593_v3 }
  0x5c   : > { %914 = vmatmul.bf16.gmra.mxu0 %v1512_v12  ;;  %v1600_v12 = vor.u32 %v1915_v5, %v1599_v4 }
  0x5d   : > { %1003 = vmatmul.bf16.gmra.mxu1 %v1516_v13  ;;  %v1604_v13 = vor.u32 %v1913_v6, %v1601_v7 }
  0x5e   : > { %1092 = vmatmul.bf16.gmra.mxu2 %v1520_v14 }
  0x5f   : > { %1181 = vmatmul.bf16.gmra.mxu3 %v1524_v15 }
  0x6c   : > { %919 = vmatmul.bf16.gmra.mxu0 %v1528_v24  ;;  %v1609_v24 = vld [vmem:[%s2112_s21 + $0x130] sm:$0xf0] }
  0x6d   : > { %1008 = vmatmul.bf16.gmra.mxu1 %v1532_v25  ;;  %v1615_v25 = vld [vmem:[%s2112_s21 + $0x128] sm:$0xf]  ;;  %v1612_v33 = vor.u32 %v1916_v23, %v1609_v24 }
  0x6e   : > { %1097 = vmatmul.bf16.gmra.mxu2 %v1536_v26  ;;  %v1919_v26 = vld [vmem:[%s2112_s21 + $0x134] sm:$0xf0] }
  0x6f   : > { %1186 = vmatmul.bf16.gmra.mxu3 %v1540_v27  ;;  %v1917_v27 = vld [vmem:[%s2112_s21 + $0x12c] sm:$0xf] }
  0x7c   : > { %924 = vmatmul.bf16.gmra.mxu0 %v1544_v36 }
  0x7d   : > { %1013 = vmatmul.bf16.gmra.mxu1 %v1548_v37  ;;  %v1616_v37 = vor.u32 %v1919_v26, %v1615_v25 }
  0x7e   : > { %1102 = vmatmul.bf16.gmra.mxu2 %v1552_v38  ;;  %v1620_v38 = vor.u32 %v1917_v27, %v1617_v28 }
  0x7f   : > { %1191 = vmatmul.bf16.gmra.mxu3 %v1556_v39 }
  0x8c   : > { %929 = vmatmul.bf16.gmra.mxu0 %v1560_v48  ;;  %v1922_v48 = vld [vmem:[%s2112_s21 + $0x14c] sm:$0xf0] }
  0x8d   : > { %1018 = vmatmul.bf16.gmra.mxu1 %v1564_v49  ;;  %v1920_v49 = vld [vmem:[%s2112_s21 + $0x144] sm:$0xf]  ;;  %v1624_v58 = vor.u32 %v1922_v48, %v1623_v47 }
  0x8e   : > { %1107 = vmatmul.bf16.gmra.mxu2 %v1568_v50  ;;  %v1625_v50 = vld [vmem:[%s2112_s21 + $0x150] sm:$0xf0] }
  0x8f   : > { %1196 = vmatmul.bf16.gmra.mxu3 %v1572_v51  ;;  %v1631_v51 = vld [vmem:[%s2112_s21 + $0x148] sm:$0xf]  ;;  %v1628_v59 = vor.u32 %v1920_v49, %v1625_v50 }
  0x9c   : > { %934 = vmatmul.bf16.gmra.mxu0 %v1576_v60 }
  0x9d   : > { %1023 = vmatmul.bf16.gmra.mxu1 %v1580_v61 }
  0x9e   : > { %1112 = vmatmul.bf16.gmra.mxu2 %v1584_v62 }
  0x9f   : > { %1201 = vmatmul.bf16.gmra.mxu3 %v1588_v63  ;;  %v1632_v63 = vor.u32 %v1923_v52, %v1631_v51 }
  0xa9   : > { %v900_v10 = vpop.f32.mrf.mxu0 }
  0xaa   : > { %v989_v11 = vpop.f32.mrf.mxu1 }
  0xab   : > { %v990_v14 = vadd.f32 %v989_v11, %v900_v10  ;;  %v1926_v10 = vld [vmem:[%s2112_s21 + $0x16c] sm:$0xf0]  ;;  %v1924_v11 = vld [vmem:[%s2112_s21 + $0x164] sm:$0xf] }
  0xac   : > { %939 = vmatmul.bf16.gmra.mxu0 %v1592_v8 }
  0xad   : > { %1028 = vmatmul.bf16.gmra.mxu1 %v1596_v9  ;;  %v1639_v9 = vld [vmem:[%s2112_s21 + $0x160] sm:$0xf] }
  0xae   : > { %1117 = vmatmul.bf16.gmra.mxu2 %v1600_v12  ;;  %v1641_v12 = vld [vmem:[%s2112_s21 + $0x170] sm:$0xf0] }
  0xaf   : > { %1206 = vmatmul.bf16.gmra.mxu3 %v1604_v13  ;;  %v1647_v13 = vld [vmem:[%s2112_s21 + $0x168] sm:$0xf]  ;;  %v1644_v21 = vor.u32 %v1924_v11, %v1641_v12 }
  0xb1   : > { %v1078_v15 = vpop.f32.mrf.mxu2  ;;  %v902_v18 = vpop.f32.mrf.mxu0 }
  0xb2   : > { %v1167_v16 = vpop.f32.mrf.mxu3  ;;  %v1079_v17 = vadd.f32 %v1078_v15, %v990_v14  ;;  %v991_v19 = vpop.f32.mrf.mxu1  ;;  %v1927_v14 = vld [vmem:[%s2112_s21 + $0x174] sm:$0xf0]  ;;  %v1925_v15 = vld [vmem:[%s2112_s21 + $0x16c] sm:$0xf] }
  0xb3   : > { %v992_v29 = vadd.f32 %v991_v19, %v902_v18  ;;  %v1648_v25 = vor.u32 %v1927_v14, %v1647_v13 }
  0xb4   : > { %v1168_v20 = vadd.f32 %v1167_v16, %v1079_v17  ;;  %v1649_v16 = vld [vmem:[%s2112_s21 + $0x178] sm:$0xf0] }
  0xb5   : > { %v1652_v26 = vor.u32 %v1925_v15, %v1649_v16 }
  0xb6   : > { %1346 = vst [vmem:[%s2208_s8] sm:$0xff] %v1168_v20  ;;  %v1640_v20 = vor.u32 %v1926_v10, %v1639_v9 }
  0xb9   : > { %v1080_v30 = vpop.f32.mrf.mxu2  ;;  %v905_v35 = vpop.f32.mrf.mxu0 }
  0xba   : > { %v1169_v31 = vpop.f32.mrf.mxu3  ;;  %v1081_v34 = vadd.f32 %v1080_v30, %v992_v29  ;;  %v994_v36 = vpop.f32.mrf.mxu1 }
  0xbb   : > { %v995_v40 = vadd.f32 %v994_v36, %v905_v35  ;;  %v1655_v35 = vld [vmem:[%s2112_s21 + $0x180] sm:$0xf]  ;;  %v1930_v36 = vld [vmem:[%s2112_s21 + $0x18c] sm:$0xf0] }
  0xbc   : > { %v1170_v39 = vadd.f32 %v1169_v31, %v1081_v34  ;;  %944 = vmatmul.bf16.gmra.mxu0 %v1608_v32 }
  0xbd   : > { %1033 = vmatmul.bf16.gmra.mxu1 %v1612_v33 }
  0xbe   : > { %1347 = vst [vmem:[%s2208_s8 + $0x8] sm:$0xff] %v1170_v39  ;;  %1122 = vmatmul.bf16.gmra.mxu2 %v1616_v37  ;;  %v1928_v37 = vld [vmem:[%s2112_s21 + $0x184] sm:$0xf]  ;;  %v1663_v39 = vld [vmem:[%s2112_s21 + $0x188] sm:$0xf] }
  0xbf   : > { %1211 = vmatmul.bf16.gmra.mxu3 %v1620_v38  ;;  %v1657_v38 = vld [vmem:[%s2112_s21 + $0x190] sm:$0xf0] }
  0xc0   : > { %v1660_v47 = vor.u32 %v1928_v37, %v1657_v38 }
  0xc1   : > { %v1083_v41 = vpop.f32.mrf.mxu2  ;;  %v907_v44 = vpop.f32.mrf.mxu0 }
  0xc2   : > { %v1172_v42 = vpop.f32.mrf.mxu3  ;;  %v1084_v43 = vadd.f32 %v1083_v41, %v995_v40  ;;  %v996_v45 = vpop.f32.mrf.mxu1  ;;  %v1931_v40 = vld [vmem:[%s2112_s21 + $0x194] sm:$0xf0]  ;;  %v1929_v41 = vld [vmem:[%s2112_s21 + $0x18c] sm:$0xf] }
  0xc3   : > { %v997_v55 = vadd.f32 %v996_v45, %v907_v44  ;;  %v1664_v51 = vor.u32 %v1931_v40, %v1663_v39 }
  0xc4   : > { %v1173_v46 = vadd.f32 %v1172_v42, %v1084_v43  ;;  %v1665_v42 = vld [vmem:[%s2112_s21 + $0x198] sm:$0xf0] }
  0xc5   : > { %v1668_v52 = vor.u32 %v1929_v41, %v1665_v42 }
  0xc6   : > { %1348 = vst [vmem:[%s2208_s8 + $0x10] sm:$0xff] %v1173_v46  ;;  %v1656_v46 = vor.u32 %v1930_v36, %v1655_v35 }
  0xc9   : > { %v1085_v56 = vpop.f32.mrf.mxu2  ;;  %v910_v61 = vpop.f32.mrf.mxu0 }
  0xca   : > { %v1174_v57 = vpop.f32.mrf.mxu3  ;;  %v1086_v60 = vadd.f32 %v1085_v56, %v997_v55  ;;  %v999_v62 = vpop.f32.mrf.mxu1 }
  0xcb   : > { %v1000_v2 = vadd.f32 %v999_v62, %v910_v61  ;;  %v1671_v61 = vld [vmem:[%s2112_s21 + $0x1a0] sm:$0xf]  ;;  %v1934_v62 = vld [vmem:[%s2112_s21 + $0x1ac] sm:$0xf0] }
  0xcc   : > { %v1175_v1 = vadd.f32 %v1174_v57, %v1086_v60  ;;  %949 = vmatmul.bf16.gmra.mxu0 %v1624_v58 }
  0xcd   : > { %1038 = vmatmul.bf16.gmra.mxu1 %v1628_v59 }
  0xce   : > { %1349 = vst [vmem:[%s2208_s8 + $0x18] sm:$0xff] %v1175_v1  ;;  %1127 = vmatmul.bf16.gmra.mxu2 %v1632_v63  ;;  %v1932_v63 = vld [vmem:[%s2112_s21 + $0x1a4] sm:$0xf]  ;;  %v1679_v1 = vld [vmem:[%s2112_s21 + $0x1a8] sm:$0xf] }
  0xcf   : > { %1216 = vmatmul.bf16.gmra.mxu3 %v1636_v0  ;;  %v1673_v0 = vld [vmem:[%s2112_s21 + $0x1b0] sm:$0xf0] }
  0xd0   : > { %v1676_v9 = vor.u32 %v1932_v63, %v1673_v0 }
  0xd1   : > { %v1088_v3 = vpop.f32.mrf.mxu2  ;;  %v912_v6 = vpop.f32.mrf.mxu0 }
  0xd2   : > { %v1177_v4 = vpop.f32.mrf.mxu3  ;;  %v1089_v5 = vadd.f32 %v1088_v3, %v1000_v2  ;;  %v1001_v7 = vpop.f32.mrf.mxu1  ;;  %v1935_v2 = vld [vmem:[%s2112_s21 + $0x1b4] sm:$0xf0]  ;;  %v1933_v3 = vld [vmem:[%s2112_s21 + $0x1ac] sm:$0xf] }
  0xd3   : > { %v1002_v17 = vadd.f32 %v1001_v7, %v912_v6  ;;  %v1680_v13 = vor.u32 %v1935_v2, %v1679_v1 }
  0xd4   : > { %v1178_v8 = vadd.f32 %v1177_v4, %v1089_v5  ;;  %v1681_v4 = vld [vmem:[%s2112_s21 + $0x1b8] sm:$0xf0] }
  0xd5   : > { %v1684_v14 = vor.u32 %v1933_v3, %v1681_v4 }
  0xd6   : > { %1350 = vst [vmem:[%s2208_s8 + $0x20] sm:$0xff] %v1178_v8  ;;  %v1672_v8 = vor.u32 %v1934_v62, %v1671_v61 }
  0xd9   : > { %v1090_v18 = vpop.f32.mrf.mxu2  ;;  %v915_v23 = vpop.f32.mrf.mxu0 }
  0xda   : > { %v1179_v19 = vpop.f32.mrf.mxu3  ;;  %v1091_v22 = vadd.f32 %v1090_v18, %v1002_v17  ;;  %v1004_v24 = vpop.f32.mrf.mxu1 }
  0xdb   : > { %v1005_v28 = vadd.f32 %v1004_v24, %v915_v23  ;;  %v1687_v23 = vld [vmem:[%s2112_s21 + $0x1c0] sm:$0xf]  ;;  %v1938_v24 = vld [vmem:[%s2112_s21 + $0x1cc] sm:$0xf0] }
  0xdc   : > { %v1180_v27 = vadd.f32 %v1179_v19, %v1091_v22  ;;  %954 = vmatmul.bf16.gmra.mxu0 %v1640_v20 }
  0xdd   : > { %1043 = vmatmul.bf16.gmra.mxu1 %v1644_v21 }
  0xde   : > { %1351 = vst [vmem:[%s2208_s8 + $0x28] sm:$0xff] %v1180_v27  ;;  %1132 = vmatmul.bf16.gmra.mxu2 %v1648_v25  ;;  %v1936_v25 = vld [vmem:[%s2112_s21 + $0x1c4] sm:$0xf]  ;;  %v1695_v27 = vld [vmem:[%s2112_s21 + $0x1c8] sm:$0xf] }
  0xdf   : > { %1221 = vmatmul.bf16.gmra.mxu3 %v1652_v26  ;;  %v1689_v26 = vld [vmem:[%s2112_s21 + $0x1d0] sm:$0xf0] }
  0xe0   : > { %v1692_v35 = vor.u32 %v1936_v25, %v1689_v26 }
  0xe1   : > { %v1093_v29 = vpop.f32.mrf.mxu2  ;;  %v917_v32 = vpop.f32.mrf.mxu0 }
  0xe2   : > { %v1182_v30 = vpop.f32.mrf.mxu3  ;;  %v1094_v31 = vadd.f32 %v1093_v29, %v1005_v28  ;;  %v1006_v33 = vpop.f32.mrf.mxu1  ;;  %v1939_v28 = vld [vmem:[%s2112_s21 + $0x1d4] sm:$0xf0]  ;;  %v1937_v29 = vld [vmem:[%s2112_s21 + $0x1cc] sm:$0xf] }
  0xe3   : > { %v1007_v43 = vadd.f32 %v1006_v33, %v917_v32  ;;  %v1696_v39 = vor.u32 %v1939_v28, %v1695_v27 }
  0xe4   : > { %v1183_v34 = vadd.f32 %v1182_v30, %v1094_v31  ;;  %v1697_v30 = vld [vmem:[%s2112_s21 + $0x1d8] sm:$0xf0] }
  0xe5   : > { %v1700_v40 = vor.u32 %v1937_v29, %v1697_v30 }
  0xe6   : > { %1352 = vst [vmem:[%s2208_s8 + $0x30] sm:$0xff] %v1183_v34  ;;  %v1688_v34 = vor.u32 %v1938_v24, %v1687_v23 }
  0xe9   : > { %v1095_v44 = vpop.f32.mrf.mxu2  ;;  %v920_v49 = vpop.f32.mrf.mxu0 }
  0xea   : > { %v1184_v45 = vpop.f32.mrf.mxu3  ;;  %v1096_v48 = vadd.f32 %v1095_v44, %v1007_v43  ;;  %v1009_v50 = vpop.f32.mrf.mxu1 }
  0xeb   : > { %v1010_v54 = vadd.f32 %v1009_v50, %v920_v49  ;;  %v1703_v49 = vld [vmem:[%s2112_s21 + $0x1e0] sm:$0xf]  ;;  %v1942_v50 = vld [vmem:[%s2112_s21 + $0x1ec] sm:$0xf0] }
  0xec   : > { %v1185_v53 = vadd.f32 %v1184_v45, %v1096_v48  ;;  %959 = vmatmul.bf16.gmra.mxu0 %v1656_v46 }
  0xed   : > { %1048 = vmatmul.bf16.gmra.mxu1 %v1660_v47 }
  0xee   : > { %1353 = vst [vmem:[%s2208_s8 + $0x38] sm:$0xff] %v1185_v53  ;;  %1137 = vmatmul.bf16.gmra.mxu2 %v1664_v51  ;;  %v1940_v51 = vld [vmem:[%s2112_s21 + $0x1e4] sm:$0xf]  ;;  %v1711_v53 = vld [vmem:[%s2112_s21 + $0x1e8] sm:$0xf] }
  0xef   : > { %1226 = vmatmul.bf16.gmra.mxu3 %v1668_v52  ;;  %v1705_v52 = vld [vmem:[%s2112_s21 + $0x1f0] sm:$0xf0] }
  0xf0   : > { %v1708_v61 = vor.u32 %v1940_v51, %v1705_v52 }
  0xf1   : > { %v1098_v55 = vpop.f32.mrf.mxu2  ;;  %v922_v58 = vpop.f32.mrf.mxu0 }
  0xf2   : > { %v1187_v56 = vpop.f32.mrf.mxu3  ;;  %v1099_v57 = vadd.f32 %v1098_v55, %v1010_v54  ;;  %v1011_v59 = vpop.f32.mrf.mxu1  ;;  %v1943_v54 = vld [vmem:[%s2112_s21 + $0x1f4] sm:$0xf0]  ;;  %v1941_v55 = vld [vmem:[%s2112_s21 + $0x1ec] sm:$0xf] }
  0xf3   : > { %v1012_v5 = vadd.f32 %v1011_v59, %v922_v58  ;;  %v1712_v1 = vor.u32 %v1943_v54, %v1711_v53 }
  0xf4   : > { %v1188_v60 = vadd.f32 %v1187_v56, %v1099_v57  ;;  %v1713_v56 = vld [vmem:[%s2112_s21 + $0x1f8] sm:$0xf0] }
  0xf5   : > { %v1716_v2 = vor.u32 %v1941_v55, %v1713_v56 }
  0xf6   : > { %1354 = vst [vmem:[%s2208_s8 + $0x40] sm:$0xff] %v1188_v60  ;;  %v1704_v60 = vor.u32 %v1942_v50, %v1703_v49 }
  0xf9   : > { %v1100_v6 = vpop.f32.mrf.mxu2  ;;  %v925_v11 = vpop.f32.mrf.mxu0 }
  0xfa   : > { %v1189_v7 = vpop.f32.mrf.mxu3  ;;  %v1101_v10 = vadd.f32 %v1100_v6, %v1012_v5  ;;  %v1014_v12 = vpop.f32.mrf.mxu1 }
  0xfb   : > { %v1015_v16 = vadd.f32 %v1014_v12, %v925_v11 }
  0xfc   : > { %v1190_v15 = vadd.f32 %v1189_v7, %v1101_v10  ;;  %964 = vmatmul.bf16.gmra.mxu0 %v1672_v8 }
  0xfd   : > { %1053 = vmatmul.bf16.gmra.mxu1 %v1676_v9 }
  0xfe   : > { %1355 = vst [vmem:[%s2208_s8 + $0x48] sm:$0xff] %v1190_v15  ;;  %1142 = vmatmul.bf16.gmra.mxu2 %v1680_v13 }
  0xff   : > { %1231 = vmatmul.bf16.gmra.mxu3 %v1684_v14 }
 0x101   : > { %v1103_v17 = vpop.f32.mrf.mxu2  ;;  %v927_v20 = vpop.f32.mrf.mxu0 }
 0x102   : > { %v1192_v18 = vpop.f32.mrf.mxu3  ;;  %v1104_v19 = vadd.f32 %v1103_v17, %v1015_v16  ;;  %v1016_v21 = vpop.f32.mrf.mxu1 }
 0x103   : > { %v1017_v31 = vadd.f32 %v1016_v21, %v927_v20 }
 0x104   : > { %v1193_v22 = vadd.f32 %v1192_v18, %v1104_v19 }
 0x106   : > { %1356 = vst [vmem:[%s2208_s8 + $0x50] sm:$0xff] %v1193_v22 }
 0x109   : > { %v1105_v32 = vpop.f32.mrf.mxu2  ;;  %v930_v37 = vpop.f32.mrf.mxu0 }
 0x10a   : > { %v1194_v33 = vpop.f32.mrf.mxu3  ;;  %v1106_v36 = vadd.f32 %v1105_v32, %v1017_v31  ;;  %v1019_v38 = vpop.f32.mrf.mxu1 }
 0x10b   : > { %v1020_v42 = vadd.f32 %v1019_v38, %v930_v37 }
 0x10c   : > { %v1195_v41 = vadd.f32 %v1194_v33, %v1106_v36  ;;  %969 = vmatmul.bf16.gmra.mxu0 %v1688_v34 }
 0x10d   : > { %1058 = vmatmul.bf16.gmra.mxu1 %v1692_v35 }
 0x10e   : > { %1357 = vst [vmem:[%s2208_s8 + $0x58] sm:$0xff] %v1195_v41  ;;  %1147 = vmatmul.bf16.gmra.mxu2 %v1696_v39 }
 0x10f   : > { %1236 = vmatmul.bf16.gmra.mxu3 %v1700_v40 }
 0x111   : > { %v1108_v43 = vpop.f32.mrf.mxu2  ;;  %v932_v46 = vpop.f32.mrf.mxu0 }
 0x112   : > { %v1197_v44 = vpop.f32.mrf.mxu3  ;;  %v1109_v45 = vadd.f32 %v1108_v43, %v1020_v42  ;;  %v1021_v47 = vpop.f32.mrf.mxu1 }
 0x113   : > { %v1022_v57 = vadd.f32 %v1021_v47, %v932_v46 }
 0x114   : > { %v1198_v48 = vadd.f32 %v1197_v44, %v1109_v45 }
 0x116   : > { %1358 = vst [vmem:[%s2208_s8 + $0x60] sm:$0xff] %v1198_v48 }
 0x119   : > { %v1110_v58 = vpop.f32.mrf.mxu2  ;;  %v935_v63 = vpop.f32.mrf.mxu0 }
 0x11a   : > { %v1199_v59 = vpop.f32.mrf.mxu3  ;;  %v1111_v62 = vadd.f32 %v1110_v58, %v1022_v57  ;;  %v1024_v0 = vpop.f32.mrf.mxu1 }
 0x11b   : > { %v1025_v4 = vadd.f32 %v1024_v0, %v935_v63 }
 0x11c   : > { %v1200_v3 = vadd.f32 %v1199_v59, %v1111_v62  ;;  %974 = vmatmul.bf16.gmra.mxu0 %v1704_v60 }
 0x11d   : > { %1063 = vmatmul.bf16.gmra.mxu1 %v1708_v61 }
 0x11e   : > { %1359 = vst [vmem:[%s2208_s8 + $0x68] sm:$0xff] %v1200_v3  ;;  %1152 = vmatmul.bf16.gmra.mxu2 %v1712_v1 }
 0x11f   : > { %1241 = vmatmul.bf16.gmra.mxu3 %v1716_v2 }
 0x121   : > { %v1113_v5 = vpop.f32.mrf.mxu2  ;;  %v937_v8 = vpop.f32.mrf.mxu0 }
 0x122   : > { %v1202_v6 = vpop.f32.mrf.mxu3  ;;  %v1114_v7 = vadd.f32 %v1113_v5, %v1025_v4  ;;  %v1026_v9 = vpop.f32.mrf.mxu1 }
 0x123   : > { %v1027_v11 = vadd.f32 %v1026_v9, %v937_v8 }
 0x124   : > { %v1203_v10 = vadd.f32 %v1202_v6, %v1114_v7 }
 0x126   : > { %1360 = vst [vmem:[%s2208_s8 + $0x70] sm:$0xff] %v1203_v10 }
 0x129   : > { %v1115_v12 = vpop.f32.mrf.mxu2  ;;  %v940_v15 = vpop.f32.mrf.mxu0 }
 0x12a   : > { %v1204_v13 = vpop.f32.mrf.mxu3  ;;  %v1116_v14 = vadd.f32 %v1115_v12, %v1027_v11  ;;  %v1029_v16 = vpop.f32.mrf.mxu1 }
 0x12b   : > { %v1030_v18 = vadd.f32 %v1029_v16, %v940_v15 }
 0x12c   : > { %v1205_v17 = vadd.f32 %v1204_v13, %v1116_v14 }
 0x12e   : > { %1361 = vst [vmem:[%s2208_s8 + $0x78] sm:$0xff] %v1205_v17 }
 0x131   : > { %v1118_v19 = vpop.f32.mrf.mxu2  ;;  %v942_v22 = vpop.f32.mrf.mxu0 }
 0x132   : > { %v1207_v20 = vpop.f32.mrf.mxu3  ;;  %v1119_v21 = vadd.f32 %v1118_v19, %v1030_v18  ;;  %v1031_v23 = vpop.f32.mrf.mxu1 }
 0x133   : > { %v1032_v25 = vadd.f32 %v1031_v23, %v942_v22 }
 0x134   : > { %v1208_v24 = vadd.f32 %v1207_v20, %v1119_v21 }
 0x136   : > { %1362 = vst [vmem:[%s2208_s8 + $0x80] sm:$0xff] %v1208_v24 }
 0x139   : > { %v1120_v26 = vpop.f32.mrf.mxu2  ;;  %v945_v29 = vpop.f32.mrf.mxu0 }
 0x13a   : > { %v1209_v27 = vpop.f32.mrf.mxu3  ;;  %v1121_v28 = vadd.f32 %v1120_v26, %v1032_v25  ;;  %v1034_v30 = vpop.f32.mrf.mxu1 }
 0x13b   : > { %v1035_v32 = vadd.f32 %v1034_v30, %v945_v29 }
 0x13c   : > { %v1210_v31 = vadd.f32 %v1209_v27, %v1121_v28 }
 0x13e   : > { %1363 = vst [vmem:[%s2208_s8 + $0x88] sm:$0xff] %v1210_v31 }
 0x141   : > { %v1123_v33 = vpop.f32.mrf.mxu2  ;;  %v947_v36 = vpop.f32.mrf.mxu0 }
 0x142   : > { %v1212_v34 = vpop.f32.mrf.mxu3  ;;  %v1124_v35 = vadd.f32 %v1123_v33, %v1035_v32  ;;  %v1036_v37 = vpop.f32.mrf.mxu1 }
 0x143   : > { %v1037_v39 = vadd.f32 %v1036_v37, %v947_v36 }
 0x144   : > { %v1213_v38 = vadd.f32 %v1212_v34, %v1124_v35 }
 0x146   : > { %1364 = vst [vmem:[%s2208_s8 + $0x90] sm:$0xff] %v1213_v38 }
 0x149   : > { %v1125_v40 = vpop.f32.mrf.mxu2  ;;  %v950_v43 = vpop.f32.mrf.mxu0 }
 0x14a   : > { %v1214_v41 = vpop.f32.mrf.mxu3  ;;  %v1126_v42 = vadd.f32 %v1125_v40, %v1037_v39  ;;  %v1039_v44 = vpop.f32.mrf.mxu1 }
 0x14b   : > { %v1040_v46 = vadd.f32 %v1039_v44, %v950_v43 }
 0x14c   : > { %v1215_v45 = vadd.f32 %v1214_v41, %v1126_v42 }
 0x14e   : > { %1365 = vst [vmem:[%s2208_s8 + $0x98] sm:$0xff] %v1215_v45 }
 0x151   : > { %v1128_v47 = vpop.f32.mrf.mxu2  ;;  %v952_v50 = vpop.f32.mrf.mxu0 }
 0x152   : > { %v1217_v48 = vpop.f32.mrf.mxu3  ;;  %v1129_v49 = vadd.f32 %v1128_v47, %v1040_v46  ;;  %v1041_v51 = vpop.f32.mrf.mxu1 }
 0x153   : > { %v1042_v53 = vadd.f32 %v1041_v51, %v952_v50 }
 0x154   : > { %v1218_v52 = vadd.f32 %v1217_v48, %v1129_v49 }
 0x156   : > { %1366 = vst [vmem:[%s2208_s8 + $0xa0] sm:$0xff] %v1218_v52 }
 0x159   : > { %v1130_v54 = vpop.f32.mrf.mxu2  ;;  %v955_v57 = vpop.f32.mrf.mxu0 }
 0x15a   : > { %v1219_v55 = vpop.f32.mrf.mxu3  ;;  %v1131_v56 = vadd.f32 %v1130_v54, %v1042_v53  ;;  %v1044_v58 = vpop.f32.mrf.mxu1 }
 0x15b   : > { %v1045_v60 = vadd.f32 %v1044_v58, %v955_v57 }
 0x15c   : > { %v1220_v59 = vadd.f32 %v1219_v55, %v1131_v56 }
 0x15e   : > { %1367 = vst [vmem:[%s2208_s8 + $0xa8] sm:$0xff] %v1220_v59 }
 0x161   : > { %v1133_v61 = vpop.f32.mrf.mxu2  ;;  %v957_v0 = vpop.f32.mrf.mxu0 }
 0x162   : > { %v1222_v62 = vpop.f32.mrf.mxu3  ;;  %v1134_v63 = vadd.f32 %v1133_v61, %v1045_v60  ;;  %v1046_v1 = vpop.f32.mrf.mxu1 }
 0x163   : > { %v1047_v3 = vadd.f32 %v1046_v1, %v957_v0 }
 0x164   : > { %v1223_v2 = vadd.f32 %v1222_v62, %v1134_v63 }
 0x166   : > { %1368 = vst [vmem:[%s2208_s8 + $0xb0] sm:$0xff] %v1223_v2 }
 0x169   : > { %v1135_v4 = vpop.f32.mrf.mxu2  ;;  %v960_v7 = vpop.f32.mrf.mxu0 }
 0x16a   : > { %v1224_v5 = vpop.f32.mrf.mxu3  ;;  %v1136_v6 = vadd.f32 %v1135_v4, %v1047_v3  ;;  %v1049_v8 = vpop.f32.mrf.mxu1 }
 0x16b   : > { %v1050_v10 = vadd.f32 %v1049_v8, %v960_v7 }
 0x16c   : > { %v1225_v9 = vadd.f32 %v1224_v5, %v1136_v6 }
 0x16e   : > { %1369 = vst [vmem:[%s2208_s8 + $0xb8] sm:$0xff] %v1225_v9 }
 0x171   : > { %v1138_v11 = vpop.f32.mrf.mxu2  ;;  %v962_v14 = vpop.f32.mrf.mxu0 }
 0x172   : > { %v1227_v12 = vpop.f32.mrf.mxu3  ;;  %v1139_v13 = vadd.f32 %v1138_v11, %v1050_v10  ;;  %v1051_v15 = vpop.f32.mrf.mxu1 }
 0x173   : > { %v1052_v17 = vadd.f32 %v1051_v15, %v962_v14 }
 0x174   : > { %v1228_v16 = vadd.f32 %v1227_v12, %v1139_v13 }
 0x176   : > { %1370 = vst [vmem:[%s2208_s8 + $0xc0] sm:$0xff] %v1228_v16 }
 0x179   : > { %v1140_v18 = vpop.f32.mrf.mxu2  ;;  %v965_v21 = vpop.f32.mrf.mxu0 }
 0x17a   : > { %v1229_v19 = vpop.f32.mrf.mxu3  ;;  %v1141_v20 = vadd.f32 %v1140_v18, %v1052_v17  ;;  %v1054_v22 = vpop.f32.mrf.mxu1 }
 0x17b   : > { %v1055_v24 = vadd.f32 %v1054_v22, %v965_v21 }
 0x17c   : > { %v1230_v23 = vadd.f32 %v1229_v19, %v1141_v20 }
 0x17e   : > { %1371 = vst [vmem:[%s2208_s8 + $0xc8] sm:$0xff] %v1230_v23 }
 0x181   : > { %v1143_v25 = vpop.f32.mrf.mxu2  ;;  %v967_v28 = vpop.f32.mrf.mxu0 }
 0x182   : > { %v1232_v26 = vpop.f32.mrf.mxu3  ;;  %v1144_v27 = vadd.f32 %v1143_v25, %v1055_v24  ;;  %v1056_v29 = vpop.f32.mrf.mxu1 }
 0x183   : > { %v1057_v31 = vadd.f32 %v1056_v29, %v967_v28 }
 0x184   : > { %v1233_v30 = vadd.f32 %v1232_v26, %v1144_v27 }
 0x186   : > { %1372 = vst [vmem:[%s2208_s8 + $0xd0] sm:$0xff] %v1233_v30 }
 0x189   : > { %v1145_v32 = vpop.f32.mrf.mxu2  ;;  %v970_v35 = vpop.f32.mrf.mxu0 }
 0x18a   : > { %v1234_v33 = vpop.f32.mrf.mxu3  ;;  %v1146_v34 = vadd.f32 %v1145_v32, %v1057_v31  ;;  %v1059_v36 = vpop.f32.mrf.mxu1 }
 0x18b   : > { %v1060_v38 = vadd.f32 %v1059_v36, %v970_v35 }
 0x18c   : > { %v1235_v37 = vadd.f32 %v1234_v33, %v1146_v34 }
 0x18e   : > { %1373 = vst [vmem:[%s2208_s8 + $0xd8] sm:$0xff] %v1235_v37 }
 0x191   : > { %v1148_v39 = vpop.f32.mrf.mxu2  ;;  %v972_v42 = vpop.f32.mrf.mxu0 }
 0x192   : > { %v1237_v40 = vpop.f32.mrf.mxu3  ;;  %v1149_v41 = vadd.f32 %v1148_v39, %v1060_v38  ;;  %v1061_v43 = vpop.f32.mrf.mxu1 }
 0x193   : > { %v1062_v45 = vadd.f32 %v1061_v43, %v972_v42 }
 0x194   : > { %v1238_v44 = vadd.f32 %v1237_v40, %v1149_v41 }
 0x196   : > { %1374 = vst [vmem:[%s2208_s8 + $0xe0] sm:$0xff] %v1238_v44 }
 0x199   : > { %v1150_v46 = vpop.f32.mrf.mxu2  ;;  %v975_v49 = vpop.f32.mrf.mxu0 }
 0x19a   : > { %v1239_v47 = vpop.f32.mrf.mxu3  ;;  %v1151_v48 = vadd.f32 %v1150_v46, %v1062_v45  ;;  %v1064_v50 = vpop.f32.mrf.mxu1 }
 0x19b   : > { %v1065_v52 = vadd.f32 %v1064_v50, %v975_v49 }
 0x19c   : > { %v1240_v51 = vadd.f32 %v1239_v47, %v1151_v48 }
 0x19e   : > { %1375 = vst [vmem:[%s2208_s8 + $0xe8] sm:$0xff] %v1240_v51 }
 0x1a1   : > { %v1153_v53 = vpop.f32.mrf.mxu2  ;;  %v977_v57 = vpop.f32.mrf.mxu0 }
 0x1a2   : > { %v1242_v54 = vpop.f32.mrf.mxu3  ;;  %v1154_v55 = vadd.f32 %v1153_v53, %v1065_v52  ;;  %v1066_v58 = vpop.f32.mrf.mxu1 }
 0x1a3   : > { %v1067_v59 = vadd.f32 %v1066_v58, %v977_v57 }
 0x1a4   : > { %v1243_v56 = vadd.f32 %v1242_v54, %v1154_v55 }
 0x1a6   : > { %1376 = vst [vmem:[%s2208_s8 + $0xf0] sm:$0xff] %v1243_v56 }
 0x1a9   : > { %v1155_v60 = vpop.f32.mrf.mxu2 }
 0x1aa   : > { %v1156_v61 = vadd.f32 %v1155_v60, %v1067_v59  ;;  %v1244_v62 = vpop.f32.mrf.mxu3 }
 0x1ac   : > { %v1245_v63 = vadd.f32 %v1244_v62, %v1156_v61 }
 0x1ae   : > { %1377 = vst [vmem:[%s2208_s8 + $0xf8] sm:$0xff] %v1245_v63 }
 0x1af PF: > { %s12_s11 = sadd.s32 1, %s1990_s11   ;;  %s2310_s9 = smov %s1986_s10 }
 0x1b0   : > { %p9_p5 = scmp.ge.s32.totalorder %s12_s11, 4   ;;  %s2311_s10 = smov %s2313_s12 }
 0x1b2   :  { %11 = sbr.rel (!%p9_p5) target bundleno = 2 (0x2), region = 67 }

</bundles_post_ra>
